<compile_context>
chip_gen: v7x
topology: tpu7x:2x2x1
jax: 0.10.0
libtpu: 0.0.40
codegen_flags: <defaults>
</compile_context>

<pallas_src>
import functools

import jax
import jax.numpy as jnp
from jax.experimental import pallas as pl
from jax.experimental.pallas import tpu as pltpu

BN_EPS = 1e-5
DEFAULT_TM = 1024                    # M rows per grid step; multiple of 128.
                                     # (can be raised to 2048-4096 on the
                                     #  128 MiB-VMEM v5e/v6e generations)
VMEM_LIMIT_BYTES = 32 * 1024 * 1024  # explicit scoped-VMEM limit; safe on
                                     # v5e (128 MiB), v6e (128 MiB), v7x (64 MiB)


# ----------------------------------------------------------------------------
# Pallas kernels
# ----------------------------------------------------------------------------
def _conv_bias_act_kernel(w_ref, p_ref, b_ref, o_ref, *, slope):
    # (Cout, K) @ (K, TM) -> (Cout, TM); bf16 MXU inputs, f32 accumulation.
    y = jnp.dot(w_ref[...], p_ref[...], preferred_element_type=jnp.float32)
    y = y + b_ref[...]
    if slope is not None:
        y = jnp.where(y >= 0.0, y, slope * y)
    o_ref[...] = y.astype(o_ref.dtype)


def _conv_stats_kernel(w_ref, p_ref, y_ref, sum_ref, ssq_ref):
    # Pass 1 of a BN layer: conv tile + per-channel sum / sum-of-squares,
    # accumulated across grid steps (sum/ssq blocks are grid-resident).
    y = jnp.dot(w_ref[...], p_ref[...], preferred_element_type=jnp.float32)
    y_ref[...] = y

    @pl.when(pl.program_id(0) == 0)
    def _():
        sum_ref[...] = jnp.zeros_like(sum_ref)
        ssq_ref[...] = jnp.zeros_like(ssq_ref)

    sum_ref[...] += jnp.sum(y, axis=1, keepdims=True)
    ssq_ref[...] += jnp.sum(y * y, axis=1, keepdims=True)


def _bn_act_kernel(y_ref, sum_ref, ssq_ref, g_ref, beta_ref, o_ref, *,
                   count, slope, eps):
    # Pass 2 of a BN layer: normalize with global batch stats + affine + LeakyReLU.
    inv_n = 1.0 / count
    mean = sum_ref[...] * inv_n
    var = ssq_ref[...] * inv_n - mean * mean          # biased var, as in PyTorch
    scale = g_ref[...] * jax.lax.rsqrt(var + eps)
    shift = beta_ref[...] - mean * scale
    z = y_ref[...] * scale + shift
    z = jnp.where(z >= 0.0, z, slope * z)
    o_ref[...] = z.astype(o_ref.dtype)


# ----------------------------------------------------------------------------
# Glue: channels-first im2col and per-layer wrapper
# ----------------------------------------------------------------------------
def _im2col_cf(a, k, stride, pad):
    # a: (C, N, H, W) -> patches^T (K, M), K = C*k*k (order c, ki, kj),
    # M = N*Ho*Wo (order n, ho, wo).
    c, n, h, w = a.shape
    ap = jnp.pad(a, ((0, 0), (0, 0), (pad, pad), (pad, pad)))
    ho = (h + 2 * pad - k) // stride + 1
    wo = (w + 2 * pad - k) // stride + 1
    cols = []
    for i in range(k):
        for j in range(k):
            cols.append(ap[:, :,
                           i:i + stride * (ho - 1) + 1:stride,
                           j:j + stride * (wo - 1) + 1:stride])
    p = jnp.stack(cols, axis=1)                       # (C, k*k, N, Ho, Wo)
    return p.reshape(c * k * k, n * ho * wo), n, ho, wo


def conv_layer(a_cf, w_pt, b, gamma, beta, *, stride, pad, use_bn, slope,
               tm=DEFAULT_TM, out_dtype=jnp.bfloat16):
    """One discriminator layer (conv [+BN] [+LeakyReLU]) via Pallas kernels."""
    assert tm % 128 == 0
    cout, cin, k, _ = w_pt.shape
    pt, n, ho, wo = _im2col_cf(a_cf, k, stride, pad)  # (K, M)
    kk, m = pt.shape

    # PyTorch weight (Cout, Cin, kh, kw) -> (Cout, K) with K order (cin, kh, kw),
    # matching the patch row order above.  bf16 for native MXU throughput.
    wt = w_pt.reshape(cout, cin * k * k).astype(jnp.bfloat16)
    pt = pt.astype(jnp.bfloat16)

    if m > tm:
        num_tiles = (m + tm - 1) // tm
        m_pad = num_tiles * tm
        tile_m = tm
        if m_pad != m:
            # Zero columns: contribute nothing to BN sums (no bias added in the
            # BN path) and the padded activations are sliced off below.
            pt = jnp.pad(pt, ((0, 0), (0, m_pad - m)))
    else:
        num_tiles, m_pad, tile_m = 1, m, m

    w_spec = pl.BlockSpec((cout, kk), lambda i: (0, 0))          # resident
    p_spec = pl.BlockSpec((kk, tile_m), lambda i: (0, i))        # streamed
    col_spec = pl.BlockSpec((cout, 1), lambda i: (0, 0))         # resident
    row_tile_spec = pl.BlockSpec((cout, tile_m), lambda i: (0, i))

    if not use_bn:
        out = pl.pallas_call(
            functools.partial(_conv_bias_act_kernel, slope=slope),
            grid=(num_tiles,),
            in_specs=[w_spec, p_spec, col_spec],
            out_specs=row_tile_spec,
            out_shape=jax.ShapeDtypeStruct((cout, m_pad), out_dtype),
            compiler_params=pltpu.CompilerParams(
                dimension_semantics=("parallel",),
                vmem_limit_bytes=VMEM_LIMIT_BYTES),
        )(wt, pt, b.reshape(cout, 1).astype(jnp.float32))
    else:
        # Pass 1: conv + global per-channel batch statistics (sequential
        # accumulation over the M axis -> "arbitrary").
        y_conv, ch_sum, ch_ssq = pl.pallas_call(
            _conv_stats_kernel,
            grid=(num_tiles,),
            in_specs=[w_spec, p_spec],
            out_specs=[row_tile_spec, col_spec, col_spec],
            out_shape=[
                jax.ShapeDtypeStruct((cout, m_pad), jnp.float32),
                jax.ShapeDtypeStruct((cout, 1), jnp.float32),
                jax.ShapeDtypeStruct((cout, 1), jnp.float32),
            ],
            compiler_params=pltpu.CompilerParams(
                dimension_semantics=("arbitrary",),
                vmem_limit_bytes=VMEM_LIMIT_BYTES),
        )(wt, pt)

        # Pass 2: normalize + affine + LeakyReLU over independent tiles.
        out = pl.pallas_call(
            functools.partial(_bn_act_kernel, count=m, slope=slope, eps=BN_EPS),
            grid=(num_tiles,),
            in_specs=[row_tile_spec, col_spec, col_spec, col_spec, col_spec],
            out_specs=row_tile_spec,
            out_shape=jax.ShapeDtypeStruct((cout, m_pad), out_dtype),
            compiler_params=pltpu.CompilerParams(
                dimension_semantics=("parallel",),
                vmem_limit_bytes=VMEM_LIMIT_BYTES),
        )(y_conv, ch_sum, ch_ssq,
          gamma.reshape(cout, 1).astype(jnp.float32),
          beta.reshape(cout, 1).astype(jnp.float32))

    return out[:, :m].reshape(cout, n, ho, wo)


# ----------------------------------------------------------------------------
# Parameters (deterministic, synthetic) and full forward
# ----------------------------------------------------------------------------
def init_params(key, input_feat, features):
    chans = [input_feat] + list(features)
    names = ["conv0", "block1", "block2", "block3", "conv1"]
    params = {}
    for idx, name in enumerate(names):
        cin, cout = chans[idx], chans[idx + 1]
        key, kw, kb, kg, kbt = jax.random.split(key, 5)
        fan_in = cin * 4 * 4
        w = jax.random.normal(kw, (cout, cin, 4, 4), jnp.float32) / jnp.sqrt(
            jnp.float32(fan_in))
        b = 0.01 * jax.random.normal(kb, (cout,), jnp.float32)
        gamma = 1.0 + 0.1 * jax.random.normal(kg, (cout,), jnp.float32)
        beta = 0.1 * jax.random.normal(kbt, (cout,), jnp.float32)
        params[name] = (w, b, gamma, beta)
    return params


def dis_forward(x_nchw, params, *, tm=DEFAULT_TM):
    a = jnp.transpose(x_nchw, (1, 0, 2, 3))             # NCHW -> (C, N, H, W)
    a = conv_layer(a, *params["conv0"], stride=2, pad=1, use_bn=False,
                   slope=0.01, tm=tm, out_dtype=jnp.bfloat16)
    a = conv_layer(a, *params["block1"], stride=2, pad=1, use_bn=True,
                   slope=0.2, tm=tm, out_dtype=jnp.bfloat16)
    a = conv_layer(a, *params["block2"], stride=2, pad=1, use_bn=True,
                   slope=0.2, tm=tm, out_dtype=jnp.bfloat16)
    a = conv_layer(a, *params["block3"], stride=1, pad=1, use_bn=True,
                   slope=0.2, tm=tm, out_dtype=jnp.bfloat16)
    a = conv_layer(a, *params["conv1"], stride=1, pad=1, use_bn=False,
                   slope=None, tm=tm, out_dtype=jnp.float32)
    return jnp.transpose(a, (1, 0, 2, 3))                # back to NCHW logits


# ----------------------------------------------------------------------------
# Pure-JAX reference (same numerical recipe: bf16 MXU inputs, f32 accumulation,
# training-mode BN with biased variance, bf16 inter-layer activations)
# ----------------------------------------------------------------------------
def _ref_layer(x_nhwc, w_pt, b, gamma, beta, *, stride, pad, use_bn, slope,
               out_dtype):
    w = jnp.transpose(w_pt, (2, 3, 1, 0)).astype(jnp.bfloat16)   # HWIO
    y = jax.lax.conv_general_dilated(
        x_nhwc.astype(jnp.bfloat16), w, window_strides=(stride, stride),
        padding=[(pad, pad), (pad, pad)],
        dimension_numbers=("NHWC", "HWIO", "NHWC"),
        preferred_element_type=jnp.float32)
    y = y + b      # kept in the reference; exactly cancelled by BN mean-sub
    if use_bn:
        mean = jnp.mean(y, axis=(0, 1, 2), keepdims=True)
        var = jnp.mean(jnp.square(y - mean), axis=(0, 1, 2), keepdims=True)
        y = (y - mean) * jax.lax.rsqrt(var + BN_EPS) * gamma + beta
    if slope is not None:
        y = jnp.where(y >= 0.0, y, slope * y)
    return y.astype(out_dtype)


def dis_forward_ref(x_nchw, params):
    y = jnp.transpose(x_nchw, (0, 2, 3, 1))
    y = _ref_layer(y, *params["conv0"], stride=2, pad=1, use_bn=False,
                   slope=0.01, out_dtype=jnp.bfloat16)
    y = _ref_layer(y, *params["block1"], stride=2, pad=1, use_bn=True,
                   slope=0.2, out_dtype=jnp.bfloat16)
    y = _ref_layer(y, *params["block2"], stride=2, pad=1, use_bn=True,
                   slope=0.2, out_dtype=jnp.bfloat16)
    y = _ref_layer(y, *params["block3"], stride=1, pad=1, use_bn=True,
                   slope=0.2, out_dtype=jnp.bfloat16)
    y = _ref_layer(y, *params["conv1"], stride=1, pad=1, use_bn=False,
                   slope=None, out_dtype=jnp.float32)
    return jnp.transpose(y, (0, 3, 1, 2))


if __name__ == "__main__":
    key = jax.random.PRNGKey(0)
    kx, kp = jax.random.split(key)

    batch, input_feat, spatial = 2, 4, 64        # spatial >= 32 so all 5 convs are valid
    features = [8, 16, 32, 32, 1]

    x = jax.random.normal(kx, (batch, input_feat, spatial, spatial), jnp.float32)
    params = init_params(kp, input_feat, features)

    # tm=256 at this small size exercises the multi-tile pipelined grid
    # (conv0: 8 tiles) and the cross-tile BN stats accumulation (block1: 2 tiles).
    fwd = jax.jit(functools.partial(dis_forward, tm=256))
    out = jax.block_until_ready(fwd(x, params))

    ref = jax.block_until_ready(jax.jit(dis_forward_ref)(x, params))

    assert out.shape == (batch, features[4], 6, 6), out.shape
    max_err = float(jnp.max(jnp.abs(out - ref)))
    assert jnp.allclose(out, ref, atol=2e-3, rtol=2e-3), max_err
    print("KERNEL_OK")
</pallas_src>

<mosaic_0001>
module attributes {stable_mosaic.version = 11 : i64} {
  func.func @_conv_bias_act_kernel(%arg0: i32, %arg1: memref<8x64xbf16, #tpu.memory_space<vmem>>, %arg2: memref<64x256xbf16, #tpu.memory_space<vmem>>, %arg3: memref<8x1xf32, #tpu.memory_space<vmem>>, %arg4: memref<8x256xbf16, #tpu.memory_space<vmem>>) attributes {dimension_semantics = [#tpu.dimension_semantics<parallel>], iteration_bounds = array<i64: 8>, scalar_prefetch = 0 : i64, scratch_operands = 0 : i64, tpu.core_type = #tpu.core_type<tc>, window_params = [{pipeline_mode = #tpu.pipeline_mode<synchronous>, transform_indices = @transform_0, window_bounds = array<i64: 8, 64>}, {transform_indices = @transform_1, window_bounds = array<i64: 64, 256>}, {pipeline_mode = #tpu.pipeline_mode<synchronous>, transform_indices = @transform_2, window_bounds = array<i64: 8, 1>}, {transform_indices = @transform_3, window_bounds = array<i64: 8, 256>}]} {
    %c0 = arith.constant 0 : index
    %c0_0 = arith.constant 0 : index
    %0 = vector.load %arg1[%c0, %c0_0] : memref<8x64xbf16, #tpu.memory_space<vmem>>, vector<8x64xbf16>
    %c0_1 = arith.constant 0 : index
    %c0_2 = arith.constant 0 : index
    %1 = vector.load %arg2[%c0_1, %c0_2] : memref<64x256xbf16, #tpu.memory_space<vmem>>, vector<64x256xbf16>
    %cst = arith.constant dense<0.000000e+00> : vector<8x256xf32>
    %2 = tpu.matmul %0, %1, %cst {dimension_numbers = #tpu.dot_dimension_numbers<[1], [0], [0], [1], [0, 0, 1, 1], [], []>} : vector<8x64xbf16>, vector<64x256xbf16>, vector<8x256xf32> -> vector<8x256xf32>
    %c0_3 = arith.constant 0 : index
    %c0_4 = arith.constant 0 : index
    %3 = vector.load %arg3[%c0_3, %c0_4] : memref<8x1xf32, #tpu.memory_space<vmem>>, vector<8x1xf32>
    %4 = vector.broadcast %3 : vector<8x1xf32> to vector<8x256xf32>
    %5 = arith.addf %2, %4 : vector<8x256xf32>
    %cst_5 = arith.constant 0.000000e+00 : f32
    %6 = vector.broadcast %cst_5 : f32 to vector<8x256xf32>
    %7 = arith.cmpf oge, %5, %6 : vector<8x256xf32>
    %cst_6 = arith.constant 0.00999999977 : f32
    %8 = vector.broadcast %cst_6 : f32 to vector<8x256xf32>
    %9 = arith.mulf %8, %5 : vector<8x256xf32>
    %10 = arith.select %7, %5, %9 : vector<8x256xi1>, vector<8x256xf32>
    %11 = arith.truncf %10 : vector<8x256xf32> to vector<8x256xbf16>
    %c0_7 = arith.constant 0 : index
    %c0_8 = arith.constant 0 : index
    %12 = vector.load %arg4[%c0_7, %c0_8] : memref<8x256xbf16, #tpu.memory_space<vmem>>, vector<8x256xbf16>
    tpu.vector_store %arg4[%c0_7, %c0_8], %11 {strides = array<i32>} : memref<8x256xbf16, #tpu.memory_space<vmem>>, vector<8x256xbf16>,
    return
  }
  func.func @transform_0(%arg0: i32) -> (i32, i32) {
    %c0_i32 = arith.constant 0 : i32
    %c0_i32_0 = arith.constant 0 : i32
    %c0_i32_1 = arith.constant 0 : i32
    return %c0_i32, %c0_i32_0 : i32, i32
  }
  func.func @transform_1(%arg0: i32) -> (i32, i32) {
    %c0_i32 = arith.constant 0 : i32
    %c0_i32_0 = arith.constant 0 : i32
    return %c0_i32, %arg0 : i32, i32
  }
  func.func @transform_2(%arg0: i32) -> (i32, i32) {
    %c0_i32 = arith.constant 0 : i32
    %c0_i32_0 = arith.constant 0 : i32
    %c0_i32_1 = arith.constant 0 : i32
    return %c0_i32, %c0_i32_0 : i32, i32
  }
  func.func @transform_3(%arg0: i32) -> (i32, i32) {
    %c0_i32 = arith.constant 0 : i32
    %c0_i32_0 = arith.constant 0 : i32
    return %c0_i32, %arg0 : i32, i32
  }
}

module attributes {stable_mosaic.version = 11 : i64} {
  func.func @_bn_act_kernel(%arg0: i32, %arg1: memref<16x256xf32, #tpu.memory_space<vmem>>, %arg2: memref<16x1xf32, #tpu.memory_space<vmem>>, %arg3: memref<16x1xf32, #tpu.memory_space<vmem>>, %arg4: memref<16x1xf32, #tpu.memory_space<vmem>>, %arg5: memref<16x1xf32, #tpu.memory_space<vmem>>, %arg6: memref<16x256xbf16, #tpu.memory_space<vmem>>) attributes {dimension_semantics = [#tpu.dimension_semantics<parallel>], iteration_bounds = array<i64: 2>, scalar_prefetch = 0 : i64, scratch_operands = 0 : i64, tpu.core_type = #tpu.core_type<tc>, window_params = [{transform_indices = @transform_0, window_bounds = array<i64: 16, 256>}, {pipeline_mode = #tpu.pipeline_mode<synchronous>, transform_indices = @transform_1, window_bounds = array<i64: 16, 1>}, {pipeline_mode = #tpu.pipeline_mode<synchronous>, transform_indices = @transform_2, window_bounds = array<i64: 16, 1>}, {pipeline_mode = #tpu.pipeline_mode<synchronous>, transform_indices = @transform_3, window_bounds = array<i64: 16, 1>}, {pipeline_mode = #tpu.pipeline_mode<synchronous>, transform_indices = @transform_4, window_bounds = array<i64: 16, 1>}, {transform_indices = @transform_5, window_bounds = array<i64: 16, 256>}]} {
    %c0 = arith.constant 0 : index
    %c0_0 = arith.constant 0 : index
    %0 = vector.load %arg2[%c0, %c0_0] : memref<16x1xf32, #tpu.memory_space<vmem>>, vector<16x1xf32>
    %cst = arith.constant 0.001953125 : f32
    %1 = vector.broadcast %cst : f32 to vector<16x1xf32>
    %2 = arith.mulf %0, %1 : vector<16x1xf32>
    %c0_1 = arith.constant 0 : index
    %c0_2 = arith.constant 0 : index
    %3 = vector.load %arg3[%c0_1, %c0_2] : memref<16x1xf32, #tpu.memory_space<vmem>>, vector<16x1xf32>
    %cst_3 = arith.constant 0.001953125 : f32
    %4 = vector.broadcast %cst_3 : f32 to vector<16x1xf32>
    %5 = arith.mulf %3, %4 : vector<16x1xf32>
    %6 = arith.mulf %2, %2 : vector<16x1xf32>
    %7 = arith.subf %5, %6 : vector<16x1xf32>
    %c0_4 = arith.constant 0 : index
    %c0_5 = arith.constant 0 : index
    %8 = vector.load %arg4[%c0_4, %c0_5] : memref<16x1xf32, #tpu.memory_space<vmem>>, vector<16x1xf32>
    %cst_6 = arith.constant 9.99999974E-6 : f32
    %9 = vector.broadcast %cst_6 : f32 to vector<16x1xf32>
    %10 = arith.addf %7, %9 : vector<16x1xf32>
    %11 = math.rsqrt %10 : vector<16x1xf32>
    %12 = arith.mulf %8, %11 : vector<16x1xf32>
    %c0_7 = arith.constant 0 : index
    %c0_8 = arith.constant 0 : index
    %13 = vector.load %arg5[%c0_7, %c0_8] : memref<16x1xf32, #tpu.memory_space<vmem>>, vector<16x1xf32>
    %14 = arith.mulf %2, %12 : vector<16x1xf32>
    %15 = arith.subf %13, %14 : vector<16x1xf32>
    %c0_9 = arith.constant 0 : index
    %c0_10 = arith.constant 0 : index
    %16 = vector.load %arg1[%c0_9, %c0_10] : memref<16x256xf32, #tpu.memory_space<vmem>>, vector<16x256xf32>
    %17 = vector.broadcast %12 : vector<16x1xf32> to vector<16x256xf32>
    %18 = arith.mulf %16, %17 : vector<16x256xf32>
    %19 = vector.broadcast %15 : vector<16x1xf32> to vector<16x256xf32>
    %20 = arith.addf %18, %19 : vector<16x256xf32>
    %cst_11 = arith.constant 0.000000e+00 : f32
    %21 = vector.broadcast %cst_11 : f32 to vector<16x256xf32>
    %22 = arith.cmpf oge, %20, %21 : vector<16x256xf32>
    %cst_12 = arith.constant 2.000000e-01 : f32
    %23 = vector.broadcast %cst_12 : f32 to vector<16x256xf32>
    %24 = arith.mulf %23, %20 : vector<16x256xf32>
    %25 = arith.select %22, %20, %24 : vector<16x256xi1>, vector<16x256xf32>
    %26 = arith.truncf %25 : vector<16x256xf32> to vector<16x256xbf16>
    %c0_13 = arith.constant 0 : index
    %c0_14 = arith.constant 0 : index
    %27 = vector.load %arg6[%c0_13, %c0_14] : memref<16x256xbf16, #tpu.memory_space<vmem>>, vector<16x256xbf16>
    tpu.vector_store %arg6[%c0_13, %c0_14], %26 {strides = array<i32>} : memref<16x256xbf16, #tpu.memory_space<vmem>>, vector<16x256xbf16>,
    return
  }
  func.func @transform_0(%arg0: i32) -> (i32, i32) {
    %c0_i32 = arith.constant 0 : i32
    %c0_i32_0 = arith.constant 0 : i32
    return %c0_i32, %arg0 : i32, i32
  }
  func.func @transform_1(%arg0: i32) -> (i32, i32) {
    %c0_i32 = arith.constant 0 : i32
    %c0_i32_0 = arith.constant 0 : i32
    %c0_i32_1 = arith.constant 0 : i32
    return %c0_i32, %c0_i32_0 : i32, i32
  }
  func.func @transform_2(%arg0: i32) -> (i32, i32) {
    %c0_i32 = arith.constant 0 : i32
    %c0_i32_0 = arith.constant 0 : i32
    %c0_i32_1 = arith.constant 0 : i32
    return %c0_i32, %c0_i32_0 : i32, i32
  }
  func.func @transform_3(%arg0: i32) -> (i32, i32) {
    %c0_i32 = arith.constant 0 : i32
    %c0_i32_0 = arith.constant 0 : i32
    %c0_i32_1 = arith.constant 0 : i32
    return %c0_i32, %c0_i32_0 : i32, i32
  }
  func.func @transform_4(%arg0: i32) -> (i32, i32) {
    %c0_i32 = arith.constant 0 : i32
    %c0_i32_0 = arith.constant 0 : i32
    %c0_i32_1 = arith.constant 0 : i32
    return %c0_i32, %c0_i32_0 : i32, i32
  }
  func.func @transform_5(%arg0: i32) -> (i32, i32) {
    %c0_i32 = arith.constant 0 : i32
    %c0_i32_0 = arith.constant 0 : i32
    return %c0_i32, %arg0 : i32, i32
  }
}

module attributes {stable_mosaic.version = 11 : i64} {
  func.func @_conv_stats_kernel(%arg0: i32, %arg1: memref<16x128xbf16, #tpu.memory_space<vmem>>, %arg2: memref<128x256xbf16, #tpu.memory_space<vmem>>, %arg3: memref<16x256xf32, #tpu.memory_space<vmem>>, %arg4: memref<16x1xf32, #tpu.memory_space<vmem>>, %arg5: memref<16x1xf32, #tpu.memory_space<vmem>>) attributes {dimension_semantics = [#tpu.dimension_semantics<arbitrary>], iteration_bounds = array<i64: 2>, scalar_prefetch = 0 : i64, scratch_operands = 0 : i64, tpu.core_type = #tpu.core_type<tc>, window_params = [{pipeline_mode = #tpu.pipeline_mode<synchronous>, transform_indices = @transform_0, window_bounds = array<i64: 16, 128>}, {transform_indices = @transform_1, window_bounds = array<i64: 128, 256>}, {transform_indices = @transform_2, window_bounds = array<i64: 16, 256>}, {pipeline_mode = #tpu.pipeline_mode<synchronous>, transform_indices = @transform_3, window_bounds = array<i64: 16, 1>}, {pipeline_mode = #tpu.pipeline_mode<synchronous>, transform_indices = @transform_4, window_bounds = array<i64: 16, 1>}]} {
    %c0 = arith.constant 0 : index
    %c0_0 = arith.constant 0 : index
    %0 = vector.load %arg1[%c0, %c0_0] : memref<16x128xbf16, #tpu.memory_space<vmem>>, vector<16x128xbf16>
    %c0_1 = arith.constant 0 : index
    %c0_2 = arith.constant 0 : index
    %1 = vector.load %arg2[%c0_1, %c0_2] : memref<128x256xbf16, #tpu.memory_space<vmem>>, vector<128x256xbf16>
    %cst = arith.constant dense<0.000000e+00> : vector<16x256xf32>
    %2 = tpu.matmul %0, %1, %cst {dimension_numbers = #tpu.dot_dimension_numbers<[1], [0], [0], [1], [0, 0, 1, 1], [], []>} : vector<16x128xbf16>, vector<128x256xbf16>, vector<16x256xf32> -> vector<16x256xf32>
    %c0_3 = arith.constant 0 : index
    %c0_4 = arith.constant 0 : index
    %3 = vector.load %arg3[%c0_3, %c0_4] : memref<16x256xf32, #tpu.memory_space<vmem>>, vector<16x256xf32>
    tpu.vector_store %arg3[%c0_3, %c0_4], %2 {strides = array<i32>} : memref<16x256xf32, #tpu.memory_space<vmem>>, vector<16x256xf32>,
    %c0_i32 = arith.constant 0 : i32
    %4 = arith.cmpi eq, %arg0, %c0_i32 : i32
    %5 = arith.extui %4 : i1 to i32
    %c0_i32_5 = arith.constant 0 : i32
    %6 = arith.cmpi ne, %5, %c0_i32_5 : i32
    scf.if %6 {
      %cst_16 = arith.constant 0.000000e+00 : f32
      %18 = vector.broadcast %cst_16 : f32 to vector<16x1xf32>
      %c0_17 = arith.constant 0 : index
      %c0_18 = arith.constant 0 : index
      %19 = vector.load %arg4[%c0_17, %c0_18] : memref<16x1xf32, #tpu.memory_space<vmem>>, vector<16x1xf32>
      tpu.vector_store %arg4[%c0_17, %c0_18], %18 {strides = array<i32>} : memref<16x1xf32, #tpu.memory_space<vmem>>, vector<16x1xf32>,
      %cst_19 = arith.constant 0.000000e+00 : f32
      %20 = vector.broadcast %cst_19 : f32 to vector<16x1xf32>
      %c0_20 = arith.constant 0 : index
      %c0_21 = arith.constant 0 : index
      %21 = vector.load %arg5[%c0_20, %c0_21] : memref<16x1xf32, #tpu.memory_space<vmem>>, vector<16x1xf32>
      tpu.vector_store %arg5[%c0_20, %c0_21], %20 {strides = array<i32>} : memref<16x1xf32, #tpu.memory_space<vmem>>, vector<16x1xf32>,
    } else {
    }
    %c0_6 = arith.constant 0 : index
    %c0_7 = arith.constant 0 : index
    %7 = vector.load %arg4[%c0_6, %c0_7] : memref<16x1xf32, #tpu.memory_space<vmem>>, vector<16x1xf32>
    %cst_8 = arith.constant dense<0.000000e+00> : vector<16xf32>
    %8 = vector.multi_reduction <add>, %2, %cst_8 [1] : vector<16x256xf32> to vector<16xf32>
    %9 = vector.shape_cast %8 : vector<16xf32> to vector<16x1xf32>
    %10 = arith.addf %7, %9 : vector<16x1xf32>
    %c0_9 = arith.constant 0 : index
    %c0_10 = arith.constant 0 : index
    %11 = vector.load %arg4[%c0_9, %c0_10] : memref<16x1xf32, #tpu.memory_space<vmem>>, vector<16x1xf32>
    tpu.vector_store %arg4[%c0_9, %c0_10], %10 {strides = array<i32>} : memref<16x1xf32, #tpu.memory_space<vmem>>, vector<16x1xf32>,
    %c0_11 = arith.constant 0 : index
    %c0_12 = arith.constant 0 : index
    %12 = vector.load %arg5[%c0_11, %c0_12] : memref<16x1xf32, #tpu.memory_space<vmem>>, vector<16x1xf32>
    %13 = arith.mulf %2, %2 : vector<16x256xf32>
    %cst_13 = arith.constant dense<0.000000e+00> : vector<16xf32>
    %14 = vector.multi_reduction <add>, %13, %cst_13 [1] : vector<16x256xf32> to vector<16xf32>
    %15 = vector.shape_cast %14 : vector<16xf32> to vector<16x1xf32>
    %16 = arith.addf %12, %15 : vector<16x1xf32>
    %c0_14 = arith.constant 0 : index
    %c0_15 = arith.constant 0 : index
    %17 = vector.load %arg5[%c0_14, %c0_15] : memref<16x1xf32, #tpu.memory_space<vmem>>, vector<16x1xf32>
    tpu.vector_store %arg5[%c0_14, %c0_15], %16 {strides = array<i32>} : memref<16x1xf32, #tpu.memory_space<vmem>>, vector<16x1xf32>,
    return
  }
  func.func @transform_0(%arg0: i32) -> (i32, i32) {
    %c0_i32 = arith.constant 0 : i32
    %c0_i32_0 = arith.constant 0 : i32
    %c0_i32_1 = arith.constant 0 : i32
    return %c0_i32, %c0_i32_0 : i32, i32
  }
  func.func @transform_1(%arg0: i32) -> (i32, i32) {
    %c0_i32 = arith.constant 0 : i32
    %c0_i32_0 = arith.constant 0 : i32
    return %c0_i32, %arg0 : i32, i32
  }
  func.func @transform_2(%arg0: i32) -> (i32, i32) {
    %c0_i32 = arith.constant 0 : i32
    %c0_i32_0 = arith.constant 0 : i32
    return %c0_i32, %arg0 : i32, i32
  }
  func.func @transform_3(%arg0: i32) -> (i32, i32) {
    %c0_i32 = arith.constant 0 : i32
    %c0_i32_0 = arith.constant 0 : i32
    %c0_i32_1 = arith.constant 0 : i32
    return %c0_i32, %c0_i32_0 : i32, i32
  }
  func.func @transform_4(%arg0: i32) -> (i32, i32) {
    %c0_i32 = arith.constant 0 : i32
    %c0_i32_0 = arith.constant 0 : i32
    %c0_i32_1 = arith.constant 0 : i32
    return %c0_i32, %c0_i32_0 : i32, i32
  }
}

module attributes {stable_mosaic.version = 11 : i64} {
  func.func @_conv_stats_kernel(%arg0: i32, %arg1: memref<32x256xbf16, #tpu.memory_space<vmem>>, %arg2: memref<256x128xbf16, #tpu.memory_space<vmem>>, %arg3: memref<32x128xf32, #tpu.memory_space<vmem>>, %arg4: memref<32x1xf32, #tpu.memory_space<vmem>>, %arg5: memref<32x1xf32, #tpu.memory_space<vmem>>) attributes {dimension_semantics = [#tpu.dimension_semantics<arbitrary>], iteration_bounds = array<i64: 1>, scalar_prefetch = 0 : i64, scratch_operands = 0 : i64, tpu.core_type = #tpu.core_type<tc>, window_params = [{pipeline_mode = #tpu.pipeline_mode<synchronous>, transform_indices = @transform_0, window_bounds = array<i64: 32, 256>}, {transform_indices = @transform_1, window_bounds = array<i64: 256, 128>}, {transform_indices = @transform_2, window_bounds = array<i64: 32, 128>}, {pipeline_mode = #tpu.pipeline_mode<synchronous>, transform_indices = @transform_3, window_bounds = array<i64: 32, 1>}, {pipeline_mode = #tpu.pipeline_mode<synchronous>, transform_indices = @transform_4, window_bounds = array<i64: 32, 1>}]} {
    %c0 = arith.constant 0 : index
    %c0_0 = arith.constant 0 : index
    %0 = vector.load %arg1[%c0, %c0_0] : memref<32x256xbf16, #tpu.memory_space<vmem>>, vector<32x256xbf16>
    %c0_1 = arith.constant 0 : index
    %c0_2 = arith.constant 0 : index
    %1 = vector.load %arg2[%c0_1, %c0_2] : memref<256x128xbf16, #tpu.memory_space<vmem>>, vector<256x128xbf16>
    %cst = arith.constant dense<0.000000e+00> : vector<32x128xf32>
    %2 = tpu.matmul %0, %1, %cst {dimension_numbers = #tpu.dot_dimension_numbers<[1], [0], [0], [1], [0, 0, 1, 1], [], []>} : vector<32x256xbf16>, vector<256x128xbf16>, vector<32x128xf32> -> vector<32x128xf32>
    %c0_3 = arith.constant 0 : index
    %c0_4 = arith.constant 0 : index
    %3 = vector.load %arg3[%c0_3, %c0_4] : memref<32x128xf32, #tpu.memory_space<vmem>>, vector<32x128xf32>
    tpu.vector_store %arg3[%c0_3, %c0_4], %2 {strides = array<i32>} : memref<32x128xf32, #tpu.memory_space<vmem>>, vector<32x128xf32>,
    %c0_i32 = arith.constant 0 : i32
    %4 = arith.cmpi eq, %arg0, %c0_i32 : i32
    %5 = arith.extui %4 : i1 to i32
    %c0_i32_5 = arith.constant 0 : i32
    %6 = arith.cmpi ne, %5, %c0_i32_5 : i32
    scf.if %6 {
      %cst_16 = arith.constant 0.000000e+00 : f32
      %18 = vector.broadcast %cst_16 : f32 to vector<32x1xf32>
      %c0_17 = arith.constant 0 : index
      %c0_18 = arith.constant 0 : index
      %19 = vector.load %arg4[%c0_17, %c0_18] : memref<32x1xf32, #tpu.memory_space<vmem>>, vector<32x1xf32>
      tpu.vector_store %arg4[%c0_17, %c0_18], %18 {strides = array<i32>} : memref<32x1xf32, #tpu.memory_space<vmem>>, vector<32x1xf32>,
      %cst_19 = arith.constant 0.000000e+00 : f32
      %20 = vector.broadcast %cst_19 : f32 to vector<32x1xf32>
      %c0_20 = arith.constant 0 : index
      %c0_21 = arith.constant 0 : index
      %21 = vector.load %arg5[%c0_20, %c0_21] : memref<32x1xf32, #tpu.memory_space<vmem>>, vector<32x1xf32>
      tpu.vector_store %arg5[%c0_20, %c0_21], %20 {strides = array<i32>} : memref<32x1xf32, #tpu.memory_space<vmem>>, vector<32x1xf32>,
    } else {
    }
    %c0_6 = arith.constant 0 : index
    %c0_7 = arith.constant 0 : index
    %7 = vector.load %arg4[%c0_6, %c0_7] : memref<32x1xf32, #tpu.memory_space<vmem>>, vector<32x1xf32>
    %cst_8 = arith.constant dense<0.000000e+00> : vector<32xf32>
    %8 = vector.multi_reduction <add>, %2, %cst_8 [1] : vector<32x128xf32> to vector<32xf32>
    %9 = vector.shape_cast %8 : vector<32xf32> to vector<32x1xf32>
    %10 = arith.addf %7, %9 : vector<32x1xf32>
    %c0_9 = arith.constant 0 : index
    %c0_10 = arith.constant 0 : index
    %11 = vector.load %arg4[%c0_9, %c0_10] : memref<32x1xf32, #tpu.memory_space<vmem>>, vector<32x1xf32>
    tpu.vector_store %arg4[%c0_9, %c0_10], %10 {strides = array<i32>} : memref<32x1xf32, #tpu.memory_space<vmem>>, vector<32x1xf32>,
    %c0_11 = arith.constant 0 : index
    %c0_12 = arith.constant 0 : index
    %12 = vector.load %arg5[%c0_11, %c0_12] : memref<32x1xf32, #tpu.memory_space<vmem>>, vector<32x1xf32>
    %13 = arith.mulf %2, %2 : vector<32x128xf32>
    %cst_13 = arith.constant dense<0.000000e+00> : vector<32xf32>
    %14 = vector.multi_reduction <add>, %13, %cst_13 [1] : vector<32x128xf32> to vector<32xf32>
    %15 = vector.shape_cast %14 : vector<32xf32> to vector<32x1xf32>
    %16 = arith.addf %12, %15 : vector<32x1xf32>
    %c0_14 = arith.constant 0 : index
    %c0_15 = arith.constant 0 : index
    %17 = vector.load %arg5[%c0_14, %c0_15] : memref<32x1xf32, #tpu.memory_space<vmem>>, vector<32x1xf32>
    tpu.vector_store %arg5[%c0_14, %c0_15], %16 {strides = array<i32>} : memref<32x1xf32, #tpu.memory_space<vmem>>, vector<32x1xf32>,
    return
  }
  func.func @transform_0(%arg0: i32) -> (i32, i32) {
    %c0_i32 = arith.constant 0 : i32
    %c0_i32_0 = arith.constant 0 : i32
    %c0_i32_1 = arith.constant 0 : i32
    return %c0_i32, %c0_i32_0 : i32, i32
  }
  func.func @transform_1(%arg0: i32) -> (i32, i32) {
    %c0_i32 = arith.constant 0 : i32
    %c0_i32_0 = arith.constant 0 : i32
    return %c0_i32, %arg0 : i32, i32
  }
  func.func @transform_2(%arg0: i32) -> (i32, i32) {
    %c0_i32 = arith.constant 0 : i32
    %c0_i32_0 = arith.constant 0 : i32
    return %c0_i32, %arg0 : i32, i32
  }
  func.func @transform_3(%arg0: i32) -> (i32, i32) {
    %c0_i32 = arith.constant 0 : i32
    %c0_i32_0 = arith.constant 0 : i32
    %c0_i32_1 = arith.constant 0 : i32
    return %c0_i32, %c0_i32_0 : i32, i32
  }
  func.func @transform_4(%arg0: i32) -> (i32, i32) {
    %c0_i32 = arith.constant 0 : i32
    %c0_i32_0 = arith.constant 0 : i32
    %c0_i32_1 = arith.constant 0 : i32
    return %c0_i32, %c0_i32_0 : i32, i32
  }
}

module attributes {stable_mosaic.version = 11 : i64} {
  func.func @_bn_act_kernel(%arg0: i32, %arg1: memref<32x128xf32, #tpu.memory_space<vmem>>, %arg2: memref<32x1xf32, #tpu.memory_space<vmem>>, %arg3: memref<32x1xf32, #tpu.memory_space<vmem>>, %arg4: memref<32x1xf32, #tpu.memory_space<vmem>>, %arg5: memref<32x1xf32, #tpu.memory_space<vmem>>, %arg6: memref<32x128xbf16, #tpu.memory_space<vmem>>) attributes {dimension_semantics = [#tpu.dimension_semantics<parallel>], iteration_bounds = array<i64: 1>, scalar_prefetch = 0 : i64, scratch_operands = 0 : i64, tpu.core_type = #tpu.core_type<tc>, window_params = [{transform_indices = @transform_0, window_bounds = array<i64: 32, 128>}, {pipeline_mode = #tpu.pipeline_mode<synchronous>, transform_indices = @transform_1, window_bounds = array<i64: 32, 1>}, {pipeline_mode = #tpu.pipeline_mode<synchronous>, transform_indices = @transform_2, window_bounds = array<i64: 32, 1>}, {pipeline_mode = #tpu.pipeline_mode<synchronous>, transform_indices = @transform_3, window_bounds = array<i64: 32, 1>}, {pipeline_mode = #tpu.pipeline_mode<synchronous>, transform_indices = @transform_4, window_bounds = array<i64: 32, 1>}, {transform_indices = @transform_5, window_bounds = array<i64: 32, 128>}]} {
    %c0 = arith.constant 0 : index
    %c0_0 = arith.constant 0 : index
    %0 = vector.load %arg2[%c0, %c0_0] : memref<32x1xf32, #tpu.memory_space<vmem>>, vector<32x1xf32>
    %cst = arith.constant 7.812500e-03 : f32
    %1 = vector.broadcast %cst : f32 to vector<32x1xf32>
    %2 = arith.mulf %0, %1 : vector<32x1xf32>
    %c0_1 = arith.constant 0 : index
    %c0_2 = arith.constant 0 : index
    %3 = vector.load %arg3[%c0_1, %c0_2] : memref<32x1xf32, #tpu.memory_space<vmem>>, vector<32x1xf32>
    %cst_3 = arith.constant 7.812500e-03 : f32
    %4 = vector.broadcast %cst_3 : f32 to vector<32x1xf32>
    %5 = arith.mulf %3, %4 : vector<32x1xf32>
    %6 = arith.mulf %2, %2 : vector<32x1xf32>
    %7 = arith.subf %5, %6 : vector<32x1xf32>
    %c0_4 = arith.constant 0 : index
    %c0_5 = arith.constant 0 : index
    %8 = vector.load %arg4[%c0_4, %c0_5] : memref<32x1xf32, #tpu.memory_space<vmem>>, vector<32x1xf32>
    %cst_6 = arith.constant 9.99999974E-6 : f32
    %9 = vector.broadcast %cst_6 : f32 to vector<32x1xf32>
    %10 = arith.addf %7, %9 : vector<32x1xf32>
    %11 = math.rsqrt %10 : vector<32x1xf32>
    %12 = arith.mulf %8, %11 : vector<32x1xf32>
    %c0_7 = arith.constant 0 : index
    %c0_8 = arith.constant 0 : index
    %13 = vector.load %arg5[%c0_7, %c0_8] : memref<32x1xf32, #tpu.memory_space<vmem>>, vector<32x1xf32>
    %14 = arith.mulf %2, %12 : vector<32x1xf32>
    %15 = arith.subf %13, %14 : vector<32x1xf32>
    %c0_9 = arith.constant 0 : index
    %c0_10 = arith.constant 0 : index
    %16 = vector.load %arg1[%c0_9, %c0_10] : memref<32x128xf32, #tpu.memory_space<vmem>>, vector<32x128xf32>
    %17 = vector.broadcast %12 : vector<32x1xf32> to vector<32x128xf32>
    %18 = arith.mulf %16, %17 : vector<32x128xf32>
    %19 = vector.broadcast %15 : vector<32x1xf32> to vector<32x128xf32>
    %20 = arith.addf %18, %19 : vector<32x128xf32>
    %cst_11 = arith.constant 0.000000e+00 : f32
    %21 = vector.broadcast %cst_11 : f32 to vector<32x128xf32>
    %22 = arith.cmpf oge, %20, %21 : vector<32x128xf32>
    %cst_12 = arith.constant 2.000000e-01 : f32
    %23 = vector.broadcast %cst_12 : f32 to vector<32x128xf32>
    %24 = arith.mulf %23, %20 : vector<32x128xf32>
    %25 = arith.select %22, %20, %24 : vector<32x128xi1>, vector<32x128xf32>
    %26 = arith.truncf %25 : vector<32x128xf32> to vector<32x128xbf16>
    %c0_13 = arith.constant 0 : index
    %c0_14 = arith.constant 0 : index
    %27 = vector.load %arg6[%c0_13, %c0_14] : memref<32x128xbf16, #tpu.memory_space<vmem>>, vector<32x128xbf16>
    tpu.vector_store %arg6[%c0_13, %c0_14], %26 {strides = array<i32>} : memref<32x128xbf16, #tpu.memory_space<vmem>>, vector<32x128xbf16>,
    return
  }
  func.func @transform_0(%arg0: i32) -> (i32, i32) {
    %c0_i32 = arith.constant 0 : i32
    %c0_i32_0 = arith.constant 0 : i32
    return %c0_i32, %arg0 : i32, i32
  }
  func.func @transform_1(%arg0: i32) -> (i32, i32) {
    %c0_i32 = arith.constant 0 : i32
    %c0_i32_0 = arith.constant 0 : i32
    %c0_i32_1 = arith.constant 0 : i32
    return %c0_i32, %c0_i32_0 : i32, i32
  }
  func.func @transform_2(%arg0: i32) -> (i32, i32) {
    %c0_i32 = arith.constant 0 : i32
    %c0_i32_0 = arith.constant 0 : i32
    %c0_i32_1 = arith.constant 0 : i32
    return %c0_i32, %c0_i32_0 : i32, i32
  }
  func.func @transform_3(%arg0: i32) -> (i32, i32) {
    %c0_i32 = arith.constant 0 : i32
    %c0_i32_0 = arith.constant 0 : i32
    %c0_i32_1 = arith.constant 0 : i32
    return %c0_i32, %c0_i32_0 : i32, i32
  }
  func.func @transform_4(%arg0: i32) -> (i32, i32) {
    %c0_i32 = arith.constant 0 : i32
    %c0_i32_0 = arith.constant 0 : i32
    %c0_i32_1 = arith.constant 0 : i32
    return %c0_i32, %c0_i32_0 : i32, i32
  }
  func.func @transform_5(%arg0: i32) -> (i32, i32) {
    %c0_i32 = arith.constant 0 : i32
    %c0_i32_0 = arith.constant 0 : i32
    return %c0_i32, %arg0 : i32, i32
  }
}

module attributes {stable_mosaic.version = 11 : i64} {
  func.func @_conv_stats_kernel(%arg0: i32, %arg1: memref<32x512xbf16, #tpu.memory_space<vmem>>, %arg2: memref<512x98xbf16, #tpu.memory_space<vmem>>, %arg3: memref<32x98xf32, #tpu.memory_space<vmem>>, %arg4: memref<32x1xf32, #tpu.memory_space<vmem>>, %arg5: memref<32x1xf32, #tpu.memory_space<vmem>>) attributes {dimension_semantics = [#tpu.dimension_semantics<arbitrary>], iteration_bounds = array<i64: 1>, scalar_prefetch = 0 : i64, scratch_operands = 0 : i64, tpu.core_type = #tpu.core_type<tc>, window_params = [{pipeline_mode = #tpu.pipeline_mode<synchronous>, transform_indices = @transform_0, window_bounds = array<i64: 32, 512>}, {transform_indices = @transform_1, window_bounds = array<i64: 512, 98>}, {transform_indices = @transform_2, window_bounds = array<i64: 32, 98>}, {pipeline_mode = #tpu.pipeline_mode<synchronous>, transform_indices = @transform_3, window_bounds = array<i64: 32, 1>}, {pipeline_mode = #tpu.pipeline_mode<synchronous>, transform_indices = @transform_4, window_bounds = array<i64: 32, 1>}]} {
    %c0 = arith.constant 0 : index
    %c0_0 = arith.constant 0 : index
    %0 = vector.load %arg1[%c0, %c0_0] : memref<32x512xbf16, #tpu.memory_space<vmem>>, vector<32x512xbf16>
    %c0_1 = arith.constant 0 : index
    %c0_2 = arith.constant 0 : index
    %1 = vector.load %arg2[%c0_1, %c0_2] : memref<512x98xbf16, #tpu.memory_space<vmem>>, vector<512x98xbf16>
    %cst = arith.constant dense<0.000000e+00> : vector<32x98xf32>
    %2 = tpu.matmul %0, %1, %cst {dimension_numbers = #tpu.dot_dimension_numbers<[1], [0], [0], [1], [0, 0, 1, 1], [], []>} : vector<32x512xbf16>, vector<512x98xbf16>, vector<32x98xf32> -> vector<32x98xf32>
    %c0_3 = arith.constant 0 : index
    %c0_4 = arith.constant 0 : index
    %3 = vector.load %arg3[%c0_3, %c0_4] : memref<32x98xf32, #tpu.memory_space<vmem>>, vector<32x98xf32>
    tpu.vector_store %arg3[%c0_3, %c0_4], %2 {strides = array<i32>} : memref<32x98xf32, #tpu.memory_space<vmem>>, vector<32x98xf32>,
    %c0_i32 = arith.constant 0 : i32
    %4 = arith.cmpi eq, %arg0, %c0_i32 : i32
    %5 = arith.extui %4 : i1 to i32
    %c0_i32_5 = arith.constant 0 : i32
    %6 = arith.cmpi ne, %5, %c0_i32_5 : i32
    scf.if %6 {
      %cst_16 = arith.constant 0.000000e+00 : f32
      %18 = vector.broadcast %cst_16 : f32 to vector<32x1xf32>
      %c0_17 = arith.constant 0 : index
      %c0_18 = arith.constant 0 : index
      %19 = vector.load %arg4[%c0_17, %c0_18] : memref<32x1xf32, #tpu.memory_space<vmem>>, vector<32x1xf32>
      tpu.vector_store %arg4[%c0_17, %c0_18], %18 {strides = array<i32>} : memref<32x1xf32, #tpu.memory_space<vmem>>, vector<32x1xf32>,
      %cst_19 = arith.constant 0.000000e+00 : f32
      %20 = vector.broadcast %cst_19 : f32 to vector<32x1xf32>
      %c0_20 = arith.constant 0 : index
      %c0_21 = arith.constant 0 : index
      %21 = vector.load %arg5[%c0_20, %c0_21] : memref<32x1xf32, #tpu.memory_space<vmem>>, vector<32x1xf32>
      tpu.vector_store %arg5[%c0_20, %c0_21], %20 {strides = array<i32>} : memref<32x1xf32, #tpu.memory_space<vmem>>, vector<32x1xf32>,
    } else {
    }
    %c0_6 = arith.constant 0 : index
    %c0_7 = arith.constant 0 : index
    %7 = vector.load %arg4[%c0_6, %c0_7] : memref<32x1xf32, #tpu.memory_space<vmem>>, vector<32x1xf32>
    %cst_8 = arith.constant dense<0.000000e+00> : vector<32xf32>
    %8 = vector.multi_reduction <add>, %2, %cst_8 [1] : vector<32x98xf32> to vector<32xf32>
    %9 = vector.shape_cast %8 : vector<32xf32> to vector<32x1xf32>
    %10 = arith.addf %7, %9 : vector<32x1xf32>
    %c0_9 = arith.constant 0 : index
    %c0_10 = arith.constant 0 : index
    %11 = vector.load %arg4[%c0_9, %c0_10] : memref<32x1xf32, #tpu.memory_space<vmem>>, vector<32x1xf32>
    tpu.vector_store %arg4[%c0_9, %c0_10], %10 {strides = array<i32>} : memref<32x1xf32, #tpu.memory_space<vmem>>, vector<32x1xf32>,
    %c0_11 = arith.constant 0 : index
    %c0_12 = arith.constant 0 : index
    %12 = vector.load %arg5[%c0_11, %c0_12] : memref<32x1xf32, #tpu.memory_space<vmem>>, vector<32x1xf32>
    %13 = arith.mulf %2, %2 : vector<32x98xf32>
    %cst_13 = arith.constant dense<0.000000e+00> : vector<32xf32>
    %14 = vector.multi_reduction <add>, %13, %cst_13 [1] : vector<32x98xf32> to vector<32xf32>
    %15 = vector.shape_cast %14 : vector<32xf32> to vector<32x1xf32>
    %16 = arith.addf %12, %15 : vector<32x1xf32>
    %c0_14 = arith.constant 0 : index
    %c0_15 = arith.constant 0 : index
    %17 = vector.load %arg5[%c0_14, %c0_15] : memref<32x1xf32, #tpu.memory_space<vmem>>, vector<32x1xf32>
    tpu.vector_store %arg5[%c0_14, %c0_15], %16 {strides = array<i32>} : memref<32x1xf32, #tpu.memory_space<vmem>>, vector<32x1xf32>,
    return
  }
  func.func @transform_0(%arg0: i32) -> (i32, i32) {
    %c0_i32 = arith.constant 0 : i32
    %c0_i32_0 = arith.constant 0 : i32
    %c0_i32_1 = arith.constant 0 : i32
    return %c0_i32, %c0_i32_0 : i32, i32
  }
  func.func @transform_1(%arg0: i32) -> (i32, i32) {
    %c0_i32 = arith.constant 0 : i32
    %c0_i32_0 = arith.constant 0 : i32
    return %c0_i32, %arg0 : i32, i32
  }
  func.func @transform_2(%arg0: i32) -> (i32, i32) {
    %c0_i32 = arith.constant 0 : i32
    %c0_i32_0 = arith.constant 0 : i32
    return %c0_i32, %arg0 : i32, i32
  }
  func.func @transform_3(%arg0: i32) -> (i32, i32) {
    %c0_i32 = arith.constant 0 : i32
    %c0_i32_0 = arith.constant 0 : i32
    %c0_i32_1 = arith.constant 0 : i32
    return %c0_i32, %c0_i32_0 : i32, i32
  }
  func.func @transform_4(%arg0: i32) -> (i32, i32) {
    %c0_i32 = arith.constant 0 : i32
    %c0_i32_0 = arith.constant 0 : i32
    %c0_i32_1 = arith.constant 0 : i32
    return %c0_i32, %c0_i32_0 : i32, i32
  }
}

module attributes {stable_mosaic.version = 11 : i64} {
  func.func @_bn_act_kernel(%arg0: i32, %arg1: memref<32x98xf32, #tpu.memory_space<vmem>>, %arg2: memref<32x1xf32, #tpu.memory_space<vmem>>, %arg3: memref<32x1xf32, #tpu.memory_space<vmem>>, %arg4: memref<32x1xf32, #tpu.memory_space<vmem>>, %arg5: memref<32x1xf32, #tpu.memory_space<vmem>>, %arg6: memref<32x98xbf16, #tpu.memory_space<vmem>>) attributes {dimension_semantics = [#tpu.dimension_semantics<parallel>], iteration_bounds = array<i64: 1>, scalar_prefetch = 0 : i64, scratch_operands = 0 : i64, tpu.core_type = #tpu.core_type<tc>, window_params = [{transform_indices = @transform_0, window_bounds = array<i64: 32, 98>}, {pipeline_mode = #tpu.pipeline_mode<synchronous>, transform_indices = @transform_1, window_bounds = array<i64: 32, 1>}, {pipeline_mode = #tpu.pipeline_mode<synchronous>, transform_indices = @transform_2, window_bounds = array<i64: 32, 1>}, {pipeline_mode = #tpu.pipeline_mode<synchronous>, transform_indices = @transform_3, window_bounds = array<i64: 32, 1>}, {pipeline_mode = #tpu.pipeline_mode<synchronous>, transform_indices = @transform_4, window_bounds = array<i64: 32, 1>}, {transform_indices = @transform_5, window_bounds = array<i64: 32, 98>}]} {
    %c0 = arith.constant 0 : index
    %c0_0 = arith.constant 0 : index
    %0 = vector.load %arg2[%c0, %c0_0] : memref<32x1xf32, #tpu.memory_space<vmem>>, vector<32x1xf32>
    %cst = arith.constant 0.0102040814 : f32
    %1 = vector.broadcast %cst : f32 to vector<32x1xf32>
    %2 = arith.mulf %0, %1 : vector<32x1xf32>
    %c0_1 = arith.constant 0 : index
    %c0_2 = arith.constant 0 : index
    %3 = vector.load %arg3[%c0_1, %c0_2] : memref<32x1xf32, #tpu.memory_space<vmem>>, vector<32x1xf32>
    %cst_3 = arith.constant 0.0102040814 : f32
    %4 = vector.broadcast %cst_3 : f32 to vector<32x1xf32>
    %5 = arith.mulf %3, %4 : vector<32x1xf32>
    %6 = arith.mulf %2, %2 : vector<32x1xf32>
    %7 = arith.subf %5, %6 : vector<32x1xf32>
    %c0_4 = arith.constant 0 : index
    %c0_5 = arith.constant 0 : index
    %8 = vector.load %arg4[%c0_4, %c0_5] : memref<32x1xf32, #tpu.memory_space<vmem>>, vector<32x1xf32>
    %cst_6 = arith.constant 9.99999974E-6 : f32
    %9 = vector.broadcast %cst_6 : f32 to vector<32x1xf32>
    %10 = arith.addf %7, %9 : vector<32x1xf32>
    %11 = math.rsqrt %10 : vector<32x1xf32>
    %12 = arith.mulf %8, %11 : vector<32x1xf32>
    %c0_7 = arith.constant 0 : index
    %c0_8 = arith.constant 0 : index
    %13 = vector.load %arg5[%c0_7, %c0_8] : memref<32x1xf32, #tpu.memory_space<vmem>>, vector<32x1xf32>
    %14 = arith.mulf %2, %12 : vector<32x1xf32>
    %15 = arith.subf %13, %14 : vector<32x1xf32>
    %c0_9 = arith.constant 0 : index
    %c0_10 = arith.constant 0 : index
    %16 = vector.load %arg1[%c0_9, %c0_10] : memref<32x98xf32, #tpu.memory_space<vmem>>, vector<32x98xf32>
    %17 = vector.broadcast %12 : vector<32x1xf32> to vector<32x98xf32>
    %18 = arith.mulf %16, %17 : vector<32x98xf32>
    %19 = vector.broadcast %15 : vector<32x1xf32> to vector<32x98xf32>
    %20 = arith.addf %18, %19 : vector<32x98xf32>
    %cst_11 = arith.constant 0.000000e+00 : f32
    %21 = vector.broadcast %cst_11 : f32 to vector<32x98xf32>
    %22 = arith.cmpf oge, %20, %21 : vector<32x98xf32>
    %cst_12 = arith.constant 2.000000e-01 : f32
    %23 = vector.broadcast %cst_12 : f32 to vector<32x98xf32>
    %24 = arith.mulf %23, %20 : vector<32x98xf32>
    %25 = arith.select %22, %20, %24 : vector<32x98xi1>, vector<32x98xf32>
    %26 = arith.truncf %25 : vector<32x98xf32> to vector<32x98xbf16>
    %c0_13 = arith.constant 0 : index
    %c0_14 = arith.constant 0 : index
    %27 = vector.load %arg6[%c0_13, %c0_14] : memref<32x98xbf16, #tpu.memory_space<vmem>>, vector<32x98xbf16>
    tpu.vector_store %arg6[%c0_13, %c0_14], %26 {strides = array<i32>} : memref<32x98xbf16, #tpu.memory_space<vmem>>, vector<32x98xbf16>,
    return
  }
  func.func @transform_0(%arg0: i32) -> (i32, i32) {
    %c0_i32 = arith.constant 0 : i32
    %c0_i32_0 = arith.constant 0 : i32
    return %c0_i32, %arg0 : i32, i32
  }
  func.func @transform_1(%arg0: i32) -> (i32, i32) {
    %c0_i32 = arith.constant 0 : i32
    %c0_i32_0 = arith.constant 0 : i32
    %c0_i32_1 = arith.constant 0 : i32
    return %c0_i32, %c0_i32_0 : i32, i32
  }
  func.func @transform_2(%arg0: i32) -> (i32, i32) {
    %c0_i32 = arith.constant 0 : i32
    %c0_i32_0 = arith.constant 0 : i32
    %c0_i32_1 = arith.constant 0 : i32
    return %c0_i32, %c0_i32_0 : i32, i32
  }
  func.func @transform_3(%arg0: i32) -> (i32, i32) {
    %c0_i32 = arith.constant 0 : i32
    %c0_i32_0 = arith.constant 0 : i32
    %c0_i32_1 = arith.constant 0 : i32
    return %c0_i32, %c0_i32_0 : i32, i32
  }
  func.func @transform_4(%arg0: i32) -> (i32, i32) {
    %c0_i32 = arith.constant 0 : i32
    %c0_i32_0 = arith.constant 0 : i32
    %c0_i32_1 = arith.constant 0 : i32
    return %c0_i32, %c0_i32_0 : i32, i32
  }
  func.func @transform_5(%arg0: i32) -> (i32, i32) {
    %c0_i32 = arith.constant 0 : i32
    %c0_i32_0 = arith.constant 0 : i32
    return %c0_i32, %arg0 : i32, i32
  }
}

module attributes {stable_mosaic.version = 11 : i64} {
  func.func @_conv_bias_act_kernel(%arg0: i32, %arg1: memref<1x512xbf16, #tpu.memory_space<vmem>>, %arg2: memref<512x72xbf16, #tpu.memory_space<vmem>>, %arg3: memref<1x1xf32, #tpu.memory_space<vmem>>, %arg4: memref<1x72xf32, #tpu.memory_space<vmem>>) attributes {dimension_semantics = [#tpu.dimension_semantics<parallel>], iteration_bounds = array<i64: 1>, scalar_prefetch = 0 : i64, scratch_operands = 0 : i64, tpu.core_type = #tpu.core_type<tc>, window_params = [{pipeline_mode = #tpu.pipeline_mode<synchronous>, transform_indices = @transform_0, window_bounds = array<i64: 1, 512>}, {transform_indices = @transform_1, window_bounds = array<i64: 512, 72>}, {pipeline_mode = #tpu.pipeline_mode<synchronous>, transform_indices = @transform_2, window_bounds = array<i64: 1, 1>}, {transform_indices = @transform_3, window_bounds = array<i64: 1, 72>}]} {
    %c0 = arith.constant 0 : index
    %c0_0 = arith.constant 0 : index
    %0 = vector.load %arg1[%c0, %c0_0] : memref<1x512xbf16, #tpu.memory_space<vmem>>, vector<1x512xbf16>
    %c0_1 = arith.constant 0 : index
    %c0_2 = arith.constant 0 : index
    %1 = vector.load %arg2[%c0_1, %c0_2] : memref<512x72xbf16, #tpu.memory_space<vmem>>, vector<512x72xbf16>
    %cst = arith.constant dense<0.000000e+00> : vector<1x72xf32>
    %2 = tpu.matmul %0, %1, %cst {dimension_numbers = #tpu.dot_dimension_numbers<[1], [0], [0], [1], [0, 0, 1, 1], [], []>} : vector<1x512xbf16>, vector<512x72xbf16>, vector<1x72xf32> -> vector<1x72xf32>
    %c0_3 = arith.constant 0 : index
    %c0_4 = arith.constant 0 : index
    %3 = vector.load %arg3[%c0_3, %c0_4] : memref<1x1xf32, #tpu.memory_space<vmem>>, vector<1x1xf32>
    %4 = vector.broadcast %3 : vector<1x1xf32> to vector<1x72xf32>
    %5 = arith.addf %2, %4 : vector<1x72xf32>
    %c0_5 = arith.constant 0 : index
    %c0_6 = arith.constant 0 : index
    %6 = vector.load %arg4[%c0_5, %c0_6] : memref<1x72xf32, #tpu.memory_space<vmem>>, vector<1x72xf32>
    tpu.vector_store %arg4[%c0_5, %c0_6], %5 {strides = array<i32>} : memref<1x72xf32, #tpu.memory_space<vmem>>, vector<1x72xf32>,
    return
  }
  func.func @transform_0(%arg0: i32) -> (i32, i32) {
    %c0_i32 = arith.constant 0 : i32
    %c0_i32_0 = arith.constant 0 : i32
    %c0_i32_1 = arith.constant 0 : i32
    return %c0_i32, %c0_i32_0 : i32, i32
  }
  func.func @transform_1(%arg0: i32) -> (i32, i32) {
    %c0_i32 = arith.constant 0 : i32
    %c0_i32_0 = arith.constant 0 : i32
    return %c0_i32, %arg0 : i32, i32
  }
  func.func @transform_2(%arg0: i32) -> (i32, i32) {
    %c0_i32 = arith.constant 0 : i32
    %c0_i32_0 = arith.constant 0 : i32
    %c0_i32_1 = arith.constant 0 : i32
    return %c0_i32, %c0_i32_0 : i32, i32
  }
  func.func @transform_3(%arg0: i32) -> (i32, i32) {
    %c0_i32 = arith.constant 0 : i32
    %c0_i32_0 = arith.constant 0 : i32
    return %c0_i32, %arg0 : i32, i32
  }
}

</mosaic_0001>

<bundles_post_ra>
// kernel: dis_forward.8
= control target key start
LH: loop header
LB: loop body
LE: loop exit
PB: predicated region body
PF: predicated region fallthrough
CT: control target
= control target key end

     0   :  { %s522_s12 = smov 0   ;;  %s524_s13 = smov 0   ;;  %s580_s0 = inlined_call_operand.vmem [shape: bf16[8,64], index: 0, kind: input, shape index: {}]   ;;  %s581_s1 = inlined_call_operand.vmem [shape: bf16[64,2048], index: 1, kind: input, shape index: {}]   ;;  %s582_s2 = inlined_call_operand.vmem [shape: f32[8,1], index: 2, kind: input, shape index: {}]   ;;  %s583_s3 = inlined_call_operand.vmem [shape: bf16[8,2048], index: 3, kind: output, shape index: {}]  }
   0x1   :  { %s526_s14 = smov 0  }
   0x2 LB: > { %s414_s15 = sadd.s32 4294967295, %s499_s14   ;;  %s539_s16 = sadd.s32 1, %s499_s14   ;;  %s499_s14 = sphi %s526_s14, %s586_s14   ;;  %s495_s13 = sphi %s524_s13, %s585_s13   ;;  %s491_s12 = sphi %s522_s12, %s584_s12  }
   0x3   : > { %s38_s17 = ssub.s32 %s499_s14, %s539_s16  ;;  %s41_s18 = sadd.s32 1, %s495_s13 }
   0x4   : > { %p39_p0 = scmp.eq.s32.totalorder %s38_s17, 0  ;;  %p48_p1 = scmp.ne.s32.totalorder %s495_s13, %s491_s12 }
   0x5   : > { %p49_p2 = scmp.eq.s32.totalorder %s499_s14, 0  ;;  %p417_p4 = scmp.ge.s32.totalorder %s499_s14, 8 }
   0x6   : > { %s548_s19 = scalar_select %p39_p0, %s495_s13, %s41_s18  }
   0x7   : > { %p50_p3 = por %p49_p2, %p48_p1  ;;  %127 = sbr.rel (%p417_p4) target bundleno = 26 (0x1a), region = 24 }
   0xe   : > { %130 = sbr.rel (!%p50_p3) target bundleno = 26 (0x1a), region = 28  ;;  %s132_s20 = sand.u32 (%p50_p3), 1, %s495_s13  }
   0xf   : > { %s437_s21 = sshll.u32 (%p50_p3), %s499_s14, 3  ;;  %s418_s22 = sshll.u32 (%p50_p3), %s132_s20, 6 }
  0x10   : > { %s137_s25 = scalar_lea.vmem (%p50_p3), %s581_s1, %s437_s21  ;;  %s134_s26 = scalar_lea.vmem (%p50_p3), [#allocation2], %s418_s22 }
  0x11   : > { %v179_v0 = vld [vmem:[%s137_s25] sm:$0xff] (%p50_p3) }
  0x12   : > { %v181_v1 = vld [vmem:[%s137_s25 + $0x40] sm:$0xff] (%p50_p3)  ;;  %180 = vst [vmem:[%s134_s26] sm:$0xff] (%p50_p3), %v179_v0 }
  0x13   : > { %v183_v2 = vld [vmem:[%s137_s25 + $0x80] sm:$0xff] (%p50_p3)  ;;  %182 = vst [vmem:[%s134_s26 + $0x8] sm:$0xff] (%p50_p3), %v181_v1 }
  0x14   : > { %184 = vst [vmem:[%s134_s26 + $0x10] sm:$0xff] (%p50_p3), %v183_v2  ;;  %v185_v3 = vld [vmem:[%s137_s25 + $0xc0] sm:$0xff] (%p50_p3) }
  0x15   : > { %v187_v4 = vld [vmem:[%s137_s25 + $0x100] sm:$0xff]  ;;  %186 = vst [vmem:[%s134_s26 + $0x18] sm:$0xff] %v185_v3 }
  0x16   : > { %v189_v5 = vld [vmem:[%s137_s25 + $0x140] sm:$0xff]  ;;  %188 = vst [vmem:[%s134_s26 + $0x20] sm:$0xff] %v187_v4 }
  0x17   : > { %190 = vst [vmem:[%s134_s26 + $0x28] sm:$0xff] %v189_v5  ;;  %v191_v6 = vld [vmem:[%s137_s25 + $0x180] sm:$0xff] }
  0x18   : > { %v193_v7 = vld [vmem:[%s137_s25 + $0x1c0] sm:$0xff]  ;;  %192 = vst [vmem:[%s134_s26 + $0x30] sm:$0xff] %v191_v6 }
  0x19   : > { %194 = vst [vmem:[%s134_s26 + $0x38] sm:$0xff] %v193_v7 }
  0x1a PF: > { %p421_p5 = scmp.ge.s32.totalorder %s499_s14, 1  ;;  %p199_p6 = scmp.lt.s32.totalorder %s499_s14, 9 }
  0x1c   : > { %p200_p7 = pnand %p421_p5, %p199_p6 }
  0x1d   : > { %s206_s27 = sand.u32 (!%p200_p7), 1, %s491_s12   ;;  %v246_v8 = vld [vmem:[%s582_s2] sm:$0xff] (!%p200_p7)  ;;  %v501_v9 = vmov (!%p200_p7), 0   ;;  %vm292_vm0 = vcmask (!%p200_p7), 523264   ;;  %s423_s7 = sshll.u32 (!%p200_p7), %s414_s15, 1 }
  0x1e   : > { %203 = sbr.rel (%p200_p7) target bundleno = 270 (0x10e), region = 66  ;;  %s422_s30 = sshll.u32 (!%p200_p7), %s206_s27, 6  ;;  %328 = vmatprep.mubr.bf16.mxu0 (!%p200_p7), %v501_v9  ;;  %464 = vset.pattern.permute.xlu0 (!%p200_p7), %v501_v9  ;;  %v237_v18 = vld [vmem:[%s580_s0] sm:$0xf] (!%p200_p7) }
  0x1f   : > { %249 = vperm.xlu0 (!%p200_p7), %464, %v246_v8   ;;  %s208_s4 = scalar_lea.vmem (!%p200_p7), [#allocation2], %s422_s30  ;;  %p231_p8 = scmp.lt.s32.totalorder (!%p200_p7), %s423_s7, 15 }
  0x20   : > { %v465_v10 = vld [vmem:[%s208_s4 + $0x4] ss:$8 sps:$4 sm:$0xff] (!%p200_p7)   ;;  %v467_v11 = vld [vmem:[%s208_s4] ss:$8 sps:$4 sm:$0xff] (!%p200_p7)   ;;  %v468_v12 = vld [vmem:[%s208_s4 + $0x14] ss:$8 sps:$4 sm:$0xff] (!%p200_p7)  }
  0x21   : > { %296 = vmatprep.subr.bf16.mxu0 (!%p200_p7), %v465_v10  ;;  %v470_v13 = vld [vmem:[%s208_s4 + $0x10] ss:$8 sps:$4 sm:$0xff] (!%p200_p7)   ;;  %v471_v14 = vld [vmem:[%s208_s4 + $0x24] ss:$8 sps:$4 sm:$0xff] (!%p200_p7)   ;;  %v473_v15 = vld [vmem:[%s208_s4 + $0x20] ss:$8 sps:$4 sm:$0xff] (!%p200_p7)  }
  0x22   : > { %297 = vmatpush1.bf16.msra.mxu0 (!%p200_p7), %v467_v11  ;;  %v474_v16 = vld [vmem:[%s208_s4 + $0x34] ss:$8 sps:$4 sm:$0xff] (!%p200_p7)   ;;  %v476_v17 = vld [vmem:[%s208_s4 + $0x30] ss:$8 sps:$4 sm:$0xff] (!%p200_p7)  }
  0x23   : > { %298 = vmatprep.subr.bf16.mxu0 (!%p200_p7), %v468_v12 }
  0x25   : > { %s588_s7 = smov (!%p231_p8, %s423_s7), 15 }
  0x26   : > { %299 = vmatpush1.bf16.msra.mxu0 %v470_v13  ;;  %s424_s8 = sshll.u32 %s588_s7, 2 }
  0x27   : > { %300 = vmatprep.subr.bf16.mxu0 %v471_v14  ;;  %s234_s11 = scalar_lea.vmem %s583_s3, %s424_s8 }
  0x2a   : > { %301 = vmatpush1.bf16.msra.mxu0 %v473_v15 }
  0x2b   : > { %302 = vmatprep.subr.bf16.mxu0 %v474_v16 }
  0x2e   : > { %303 = vmatpush1.bf16.msra.mxu0 %v476_v17 }
  0x31   : > { %433 = vmatmul.mubr.msk.bf16.vlgmr.msra.gmra.mrb[0].mxu0 %vm292_vm0, %v237_v18 }
  0x9e   : > { %v250_v19 = vpop.permute.xlu0 %249 }
 0x104   : > { %v330_v20 = vpop.f32.mrb[0].mxu0 }
 0x105   : > { %v331_v21 = vadd.f32 %v330_v20, %v250_v19  ;;  %v332_v22 = vpop.f32.mrb[1].mxu0 }
 0x106   : > { %v333_v23 = vadd.f32 %v332_v22, %v250_v19  ;;  %v334_v24 = vpop.f32.mrb[2].mxu0 }
 0x107   : > { %vm337_vm1 = vcmp.ge.f32.partialorder %v331_v21, 0.0  ;;  %v339_v25 = vmul.f32 0.01, %v331_v21  ;;  %v335_v26 = vpop.f32.mrb[3].mxu0 }
 0x108   : > { %vm338_vm2 = vcmp.ge.f32.partialorder %v333_v23, 0.0  ;;  %v340_v27 = vmul.f32 0.01, %v333_v23 }
 0x109   : > { %v341_v28 = vsel %vm337_vm1, %v331_v21, %v339_v25 }
 0x10a   : > { %v342_v29 = vsel %vm338_vm2, %v333_v23, %v340_v27 }
 0x10b   : > { %v438_v30 = vpack.c.bf16 %v342_v29, %v341_v28 }
 0x10d   : > { %351 = vst [vmem:[%s234_s11] sm:$0xff] %v438_v30 }
 0x10e PF: > { %p10_p9 = scmp.ge.s32.totalorder %s539_s16, 10   ;;  %s584_s12 = smov %s495_s13 }
 0x10f   : > { %s585_s13 = smov %s548_s19  ;;  %s586_s14 = smov %s539_s16 }
 0x110   :  { %12 = sbr.rel (!%p10_p9) target bundleno = 2 (0x2), region = 105 }

// kernel: dis_forward.10
= control target key start
LH: loop header
LB: loop body
LE: loop exit
PB: predicated region body
PF: predicated region fallthrough
CT: control target
= control target key end

     0   :  { %s540_s18 = smov 0   ;;  %s542_s19 = smov 0   ;;  %s624_s0 = inlined_call_operand.vmem [shape: f32[16,512], index: 0, kind: input, shape index: {}]   ;;  %s625_s1 = inlined_call_operand.vmem [shape: f32[16,1], index: 1, kind: input, shape index: {}]   ;;  %s626_s2 = inlined_call_operand.vmem [shape: f32[16,1], index: 2, kind: input, shape index: {}]   ;;  %s627_s3 = inlined_call_operand.vmem [shape: f32[16,1], index: 3, kind: input, shape index: {}]   ;;  %s628_s4 = inlined_call_operand.vmem [shape: f32[16,1], index: 4, kind: input, shape index: {}]   ;;  %s629_s5 = inlined_call_operand.vmem [shape: bf16[16,512], index: 5, kind: output, shape index: {}]  }
   0x1   :  { %s544_s20 = smov 0  }
   0x2 LB: > { %s433_s21 = sadd.s32 4294967295, %s507_s20   ;;  %s557_s22 = sadd.s32 1, %s507_s20   ;;  %s507_s20 = sphi %s544_s20, %s633_s20   ;;  %s503_s19 = sphi %s542_s19, %s632_s19   ;;  %s499_s18 = sphi %s540_s18, %s631_s18  }
   0x3   : > { %s19_s23 = ssub.s32 %s507_s20, %s557_s22  ;;  %s22_s24 = sadd.s32 1, %s503_s19 }
   0x4   : > { %p20_p0 = scmp.eq.s32.totalorder %s19_s23, 0  ;;  %p29_p1 = scmp.ne.s32.totalorder %s503_s19, %s499_s18 }
   0x5   : > { %p30_p2 = scmp.eq.s32.totalorder %s507_s20, 0  ;;  %p143_p3 = scmp.eq.s32.totalorder %s433_s21, 1 }
   0x6   : > { %s568_s25 = scalar_select %p20_p0, %s503_s19, %s22_s24  }
   0x7   : > { %p31_p4 = por %p30_p2, %p29_p1  ;;  %p570_p5 = por %p143_p3, %p29_p1 }
   0x8   : > { %p436_p6 = scmp.ge.s32.totalorder %s507_s20, 2 }
   0xa   : > { %177 = sbr.rel (%p436_p6) target bundleno = 24 (0x18), region = 32 }
  0x11   : > { %180 = sbr.rel (!%p31_p4) target bundleno = 24 (0x18), region = 36  ;;  %s182_s27 = sand.u32 (%p31_p4), 1, %s503_s19  }
  0x12   : > { %s450_s28 = sshll.u32 (%p31_p4), %s507_s20, 4  ;;  %s437_s29 = sshll.u32 (%p31_p4), %s182_s27, 5 }
  0x13   : > { %s187_s7 = scalar_lea.vmem (%p31_p4), %s624_s0, %s450_s28  ;;  %s184_s8 = scalar_lea.vmem (%p31_p4), [#allocation2], %s437_s29 }
  0x14   : > { %v200_v0 = vld [vmem:[%s187_s7] sm:$0xff] (%p31_p4)  ;;  %v202_v1 = vld [vmem:[%s187_s7 + $0x8] sm:$0xff] (%p31_p4) }
  0x15   : > { %v204_v2 = vld [vmem:[%s187_s7 + $0x20] sm:$0xff] (%p31_p4)  ;;  %201 = vst [vmem:[%s184_s8] sm:$0xff] (%p31_p4), %v200_v0  ;;  %203 = vst [vmem:[%s184_s8 + $0x8] sm:$0xff] (%p31_p4), %v202_v1  ;;  %v206_v3 = vld [vmem:[%s187_s7 + $0x28] sm:$0xff] (%p31_p4) }
  0x16   : > { %205 = vst [vmem:[%s184_s8 + $0x10] sm:$0xff] (%p31_p4), %v204_v2  ;;  %207 = vst [vmem:[%s184_s8 + $0x18] sm:$0xff] (%p31_p4), %v206_v3 }
  0x18 PF: > { %p440_p7 = scmp.ge.s32.totalorder %s507_s20, 1  ;;  %p212_p8 = scmp.lt.s32.totalorder %s507_s20, 3 }
  0x1a   : > { %p213_p9 = pnand %p440_p7, %p212_p8 }
  0x1b   : > { %v247_v4 = vld [vmem:[%s625_s1] sm:$0xff] (!%p213_p9)  ;;  %v509_v6 = vmov (!%p213_p9), 0   ;;  %v248_v9 = vld [vmem:[%s625_s1 + $0x8] sm:$0xff] (!%p213_p9)  ;;  %s219_s7 = sand.u32 (!%p213_p9), 1, %s499_s18  }
  0x1c   : > { %216 = sbr.rel (%p213_p9) target bundleno = 201 (0xc9), region = 59  ;;  %v251_v5 = vld [vmem:[%s626_s2] sm:$0xff] (!%p213_p9)  ;;  %479 = vset.pattern.permute.xlu0 (!%p213_p9), %v509_v6  ;;  %v249_v7 = vmul.f32 (!%p213_p9), 0.001953125, %v247_v4  ;;  %480 = vset.pattern.permute.xlu1 (!%p213_p9), %v509_v6  ;;  %v252_v10 = vld [vmem:[%s626_s2 + $0x8] sm:$0xff] (!%p213_p9)  ;;  %v250_v11 = vmul.f32 (!%p213_p9), 0.001953125, %v248_v9  ;;  %s441_s8 = sshll.u32 (!%p213_p9), %s219_s7, 5 }
  0x1d   : > { %v253_v8 = vmul.f32 (!%p213_p9), 0.001953125, %v251_v5  ;;  %v254_v12 = vmul.f32 (!%p213_p9), 0.001953125, %v252_v10  ;;  %v259_v19 = vld [vmem:[%s627_s3] sm:$0xff] (!%p213_p9)  ;;  %v260_v20 = vld [vmem:[%s627_s3 + $0x8] sm:$0xff] (!%p213_p9)  ;;  %s221_s9 = scalar_lea.vmem (!%p213_p9), [#allocation2], %s441_s8  ;;  %s442_s10 = sshll.u32 (!%p213_p9), %s219_s7, 4 }
  0x1e   : > { %v255_v13 = vmul.f32 (!%p213_p9), %v249_v7, %v249_v7  ;;  %v256_v14 = vmul.f32 (!%p213_p9), %v250_v11, %v250_v11  ;;  %v267_v25 = vld [vmem:[%s628_s4] sm:$0xff] (!%p213_p9)  ;;  %v268_v27 = vld [vmem:[%s628_s4 + $0x8] sm:$0xff] (!%p213_p9)  ;;  %v275_v36 = vld [vmem:[%s221_s9 + $0x10] sm:$0xff] (!%p213_p9)  ;;  %s244_s18 = scalar_lea.vmem (!%p213_p9), [#allocation3], %s442_s10 }
  0x1f   : > { %v273_v31 = vld [vmem:[%s221_s9] sm:$0xff] (!%p213_p9)  ;;  %v274_v32 = vld [vmem:[%s221_s9 + $0x8] sm:$0xff] (!%p213_p9)  ;;  %v276_v37 = vld [vmem:[%s221_s9 + $0x18] sm:$0xff] (!%p213_p9) }
  0x20   : > { %v257_v15 = vsub.f32 (!%p213_p9), %v253_v8, %v255_v13  ;;  %v258_v16 = vsub.f32 (!%p213_p9), %v254_v12, %v256_v14 }
  0x22   : > { %v261_v17 = vadd.f32 (!%p213_p9), 1e-05, %v257_v15  ;;  %v262_v18 = vadd.f32 (!%p213_p9), 1e-05, %v258_v16 }
  0x23   : > { %s453_s11 = sshll.u32 (%p570_p5), %s433_s21, 3 }
  0x24   : > { %481 = vrsqrt.f32 %v261_v17  ;;  %s340_s14 = scalar_lea.vmem (%p570_p5), %s629_s5, %s453_s11 }
  0x25   : > { %483 = vrsqrt.f32 %v262_v18 }
  0x2e   : > { %v482_v21 = vpop.eup %481 }
  0x2f   : > { %v484_v22 = vpop.eup %483  ;;  %v265_v23 = vmul.f32 %v482_v21, %v259_v19 }
  0x30   : > { %v266_v24 = vmul.f32 %v484_v22, %v260_v20 }
  0x31   : > { %279 = vperm.xlu0 %479, %v265_v23   ;;  %v269_v26 = vmul.f32 %v265_v23, %v249_v7 }
  0x32   : > { %v270_v28 = vmul.f32 %v266_v24, %v250_v11 }
  0x33   : > { %v271_v29 = vsub.f32 %v267_v25, %v269_v26 }
  0x34   : > { %v272_v30 = vsub.f32 %v268_v27, %v270_v28 }
  0x35   : > { %284 = vperm.xlu0 %479, %v266_v24   ;;  %293 = vperm.xlu1 %480, %v271_v29  }
  0x39   : > { %298 = vperm.xlu1 %480, %v272_v30  }
  0xb0   : > { %v280_v33 = vpop.permute.xlu0 %279 }
  0xb1   : > { %v287_v34 = vmul.f32 %v280_v33, %v273_v31  ;;  %v288_v35 = vmul.f32 %v280_v33, %v274_v32 }
  0xb4   : > { %v285_v38 = vpop.permute.xlu0 %284  ;;  %v294_v39 = vpop.permute.xlu1 %293 }
  0xb5   : > { %v301_v40 = vadd.f32 %v294_v39, %v287_v34  ;;  %v302_v41 = vadd.f32 %v294_v39, %v288_v35  ;;  %v289_v42 = vmul.f32 %v285_v38, %v275_v36  ;;  %v290_v43 = vmul.f32 %v285_v38, %v276_v37 }
  0xb7   : > { %vm305_vm0 = vcmp.ge.f32.partialorder %v301_v40, 0.0  ;;  %vm306_vm1 = vcmp.ge.f32.partialorder %v302_v41, 0.0  ;;  %v309_v44 = vmul.f32 0.2, %v301_v40  ;;  %v310_v45 = vmul.f32 0.2, %v302_v41 }
  0xb8   : > { %v299_v46 = vpop.permute.xlu1 %298 }
  0xb9   : > { %v313_v47 = vsel %vm305_vm0, %v301_v40, %v309_v44  ;;  %v314_v48 = vsel %vm306_vm1, %v302_v41, %v310_v45  ;;  %v303_v49 = vadd.f32 %v299_v46, %v289_v42  ;;  %v304_v50 = vadd.f32 %v299_v46, %v290_v43 }
  0xba   : > { %v451_v51 = vpack.c.bf16 %v314_v48, %v313_v47  ;;  %337 = sbr.rel (!%p570_p5) target bundleno = 201 (0xc9), region = 67 }
  0xbb   : > { %vm307_vm2 = vcmp.ge.f32.partialorder %v303_v49, 0.0  ;;  %vm308_vm3 = vcmp.ge.f32.partialorder %v304_v50, 0.0  ;;  %v311_v52 = vmul.f32 0.2, %v303_v49  ;;  %v312_v53 = vmul.f32 0.2, %v304_v50 }
  0xbc   : > { %329 = vst [vmem:[%s244_s18] sm:$0xff] %v451_v51 }
  0xbd   : > { %v315_v54 = vsel %vm307_vm2, %v303_v49, %v311_v52  ;;  %v316_v55 = vsel %vm308_vm3, %v304_v50, %v312_v53 }
  0xbe   : > { %v452_v56 = vpack.c.bf16 %v316_v55, %v315_v54 }
  0xc0   : > { %330 = vst [vmem:[%s244_s18 + $0x8] sm:$0xff] %v452_v56 }
  0xc3   : > { %v370_v57 = vld [vmem:[%s244_s18] sm:$0xff] }
  0xc4   : > { %371 = vst [vmem:[%s340_s14] sm:$0xff] %v370_v57 }
  0xc7   : > { %v372_v58 = vld [vmem:[%s244_s18 + $0x8] sm:$0xff] }
  0xc8   : > { %373 = vst [vmem:[%s340_s14 + $0x10] sm:$0xff] %v372_v58 }
  0xc9 PF: > { %p12_p10 = scmp.ge.s32.totalorder %s557_s22, 4   ;;  %s631_s18 = smov %s503_s19 }
  0xca   : > { %s632_s19 = smov %s568_s25  ;;  %s633_s20 = smov %s557_s22 }
  0xcb   :  { %14 = sbr.rel (!%p12_p10) target bundleno = 2 (0x2), region = 136 }

// kernel: dis_forward.9
= control target key start
LH: loop header
LB: loop body
LE: loop exit
PB: predicated region body
PF: predicated region fallthrough
CT: control target
= control target key end

     0   :  { %s712_s15 = smov 0   ;;  %s714_s16 = smov 0   ;;  %s844_s0 = inlined_call_operand.vmem [shape: bf16[16,128], index: 0, kind: input, shape index: {}]   ;;  %s845_s1 = inlined_call_operand.vmem [shape: bf16[128,512], index: 1, kind: input, shape index: {}]   ;;  %s846_s2 = inlined_call_operand.vmem [shape: f32[16,512], index: 2, kind: output, shape index: {0}]   ;;  %s847_s3 = inlined_call_operand.vmem [shape: f32[16,1], index: 3, kind: output, shape index: {1}]   ;;  %s848_s4 = inlined_call_operand.vmem [shape: f32[16,1], index: 4, kind: output, shape index: {2}]  }
   0x1   :  { %s716_s17 = smov 0  }
   0x2 LB: > { %s728_s18 = sadd.s32 4294967295, %s683_s17   ;;  %s731_s19 = sadd.s32 1, %s683_s17   ;;  %s683_s17 = sphi %s716_s17, %s852_s17   ;;  %s679_s16 = sphi %s714_s16, %s851_s16   ;;  %s675_s15 = sphi %s712_s15, %s850_s15  }
   0x3   : > { %s40_s20 = ssub.s32 %s683_s17, %s731_s19  ;;  %s43_s21 = sadd.s32 1, %s679_s16 }
   0x4   : > { %p41_p0 = scmp.eq.s32.totalorder %s40_s20, 0  ;;  %p50_p1 = scmp.ne.s32.totalorder %s679_s16, %s675_s15 }
   0x5   : > { %p51_p2 = scmp.eq.s32.totalorder %s683_s17, 0  ;;  %p80_p3 = scmp.eq.s32.totalorder %s728_s18, 1 }
   0x6   : > { %s741_s22 = scalar_select %p41_p0, %s679_s16, %s43_s21  }
   0x7   : > { %p52_p4 = por %p51_p2, %p50_p1  ;;  %p743_p5 = por %p80_p3, %p50_p1 }
   0x8   : > { %p578_p6 = scmp.ge.s32.totalorder %s683_s17, 2 }
   0xa   : > { %147 = sbr.rel (%p578_p6) target bundleno = 29 (0x1d), region = 20 }
  0x11   : > { %150 = sbr.rel (!%p52_p4) target bundleno = 29 (0x1d), region = 24  ;;  %s152_s24 = sand.u32 (%p52_p4), 1, %s679_s16  }
  0x12   : > { %s608_s25 = sshll.u32 (%p52_p4), %s683_s17, 3  ;;  %s579_s26 = sshll.u32 (%p52_p4), %s152_s24, 7 }
  0x13   : > { %s753_s29 = scalar_lea.vmem (%p52_p4), %s845_s1, %s608_s25  ;;  %s154_s30 = scalar_lea.vmem (%p52_p4), [#allocation2], %s579_s26 }
  0x14   : > { %v215_v0 = vld [vmem:[%s753_s29] sm:$0xff] (%p52_p4)  ;;  %v217_v1 = vld [vmem:[%s753_s29 + $0x10] sm:$0xff] (%p52_p4) }
  0x15   : > { %v219_v2 = vld [vmem:[%s753_s29 + $0x20] sm:$0xff] (%p52_p4)  ;;  %216 = vst [vmem:[%s154_s30] sm:$0xff] (%p52_p4), %v215_v0  ;;  %218 = vst [vmem:[%s154_s30 + $0x8] sm:$0xff] (%p52_p4), %v217_v1  ;;  %v221_v3 = vld [vmem:[%s753_s29 + $0x30] sm:$0xff] (%p52_p4) }
  0x16   : > { %220 = vst [vmem:[%s154_s30 + $0x10] sm:$0xff] (%p52_p4), %v219_v2  ;;  %v223_v4 = vld [vmem:[%s753_s29 + $0x40] sm:$0xff] (%p52_p4)  ;;  %v225_v5 = vld [vmem:[%s753_s29 + $0x50] sm:$0xff] (%p52_p4)  ;;  %222 = vst [vmem:[%s154_s30 + $0x18] sm:$0xff] (%p52_p4), %v221_v3 }
  0x17   : > { %224 = vst [vmem:[%s154_s30 + $0x20] sm:$0xff] (%p52_p4), %v223_v4  ;;  %226 = vst [vmem:[%s154_s30 + $0x28] sm:$0xff] (%p52_p4), %v225_v5  ;;  %v227_v6 = vld [vmem:[%s753_s29 + $0x60] sm:$0xff] (%p52_p4)  ;;  %v229_v7 = vld [vmem:[%s753_s29 + $0x70] sm:$0xff] (%p52_p4) }
  0x18   : > { %v231_v8 = vld [vmem:[%s753_s29 + $0x80] sm:$0xff]  ;;  %228 = vst [vmem:[%s154_s30 + $0x30] sm:$0xff] %v227_v6  ;;  %230 = vst [vmem:[%s154_s30 + $0x38] sm:$0xff] %v229_v7  ;;  %v233_v9 = vld [vmem:[%s753_s29 + $0x90] sm:$0xff] }
  0x19   : > { %232 = vst [vmem:[%s154_s30 + $0x40] sm:$0xff] %v231_v8  ;;  %v235_v10 = vld [vmem:[%s753_s29 + $0xa0] sm:$0xff]  ;;  %v237_v11 = vld [vmem:[%s753_s29 + $0xb0] sm:$0xff]  ;;  %234 = vst [vmem:[%s154_s30 + $0x48] sm:$0xff] %v233_v9 }
  0x1a   : > { %236 = vst [vmem:[%s154_s30 + $0x50] sm:$0xff] %v235_v10  ;;  %238 = vst [vmem:[%s154_s30 + $0x58] sm:$0xff] %v237_v11  ;;  %v239_v12 = vld [vmem:[%s753_s29 + $0xc0] sm:$0xff]  ;;  %v241_v13 = vld [vmem:[%s753_s29 + $0xd0] sm:$0xff] }
  0x1b   : > { %v243_v14 = vld [vmem:[%s753_s29 + $0xe0] sm:$0xff]  ;;  %240 = vst [vmem:[%s154_s30 + $0x60] sm:$0xff] %v239_v12  ;;  %242 = vst [vmem:[%s154_s30 + $0x68] sm:$0xff] %v241_v13  ;;  %v245_v15 = vld [vmem:[%s753_s29 + $0xf0] sm:$0xff] }
  0x1c   : > { %244 = vst [vmem:[%s154_s30 + $0x70] sm:$0xff] %v243_v14  ;;  %246 = vst [vmem:[%s154_s30 + $0x78] sm:$0xff] %v245_v15 }
  0x1d PF: > { %p582_p7 = scmp.ge.s32.totalorder %s683_s17, 1  ;;  %p251_p8 = scmp.lt.s32.totalorder %s683_s17, 3 }
  0x1f   : > { %p252_p9 = pnand %p582_p7, %p251_p8 }
  0x20   : > { %s258_s5 = sand.u32 (!%p252_p9), 1, %s675_s15   ;;  %v685_v16 = vmov (!%p252_p9), 0   ;;  %v660_v33 = vld [vmem:[%s844_s0] sm:$0xff] (!%p252_p9)   ;;  %p602_p10 = scmp.ne.s32.totalorder (!%p252_p9), %s728_s18, 0 }
  0x21   : > { %255 = sbr.rel (%p252_p9) target bundleno = 437 (0x1b5), region = 62  ;;  %s583_s6 = sshll.u32 (!%p252_p9), %s258_s5, 7  ;;  %421 = vmatprep.mubr.bf16.mxu0 (!%p252_p9), %v685_v16 }
  0x22   : > { %s260_s7 = scalar_lea.vmem (!%p252_p9), [#allocation2], %s583_s6  ;;  %s584_s10 = sshll.u32 (!%p252_p9), %s258_s5, 5 }
  0x23   : > { %v636_v17 = vld [vmem:[%s260_s7 + $0x4] ss:$8 sps:$4 sm:$0xff] (!%p252_p9)   ;;  %v638_v18 = vld [vmem:[%s260_s7] ss:$8 sps:$4 sm:$0xff] (!%p252_p9)   ;;  %v639_v19 = vld [vmem:[%s260_s7 + $0x14] ss:$8 sps:$4 sm:$0xff] (!%p252_p9)  }
  0x24   : > { %389 = vmatprep.subr.bf16.mxu0 (!%p252_p9), %v636_v17  ;;  %v641_v20 = vld [vmem:[%s260_s7 + $0x10] ss:$8 sps:$4 sm:$0xff] (!%p252_p9)   ;;  %v642_v21 = vld [vmem:[%s260_s7 + $0x24] ss:$8 sps:$4 sm:$0xff] (!%p252_p9)   ;;  %v644_v22 = vld [vmem:[%s260_s7 + $0x20] ss:$8 sps:$4 sm:$0xff] (!%p252_p9)  }
  0x25   : > { %390 = vmatpush1.bf16.msra.mxu0 (!%p252_p9), %v638_v18  ;;  %v645_v23 = vld [vmem:[%s260_s7 + $0x34] ss:$8 sps:$4 sm:$0xff] (!%p252_p9)   ;;  %v647_v24 = vld [vmem:[%s260_s7 + $0x30] ss:$8 sps:$4 sm:$0xff] (!%p252_p9)   ;;  %v648_v25 = vld [vmem:[%s260_s7 + $0x44] ss:$8 sps:$4 sm:$0xff] (!%p252_p9)  }
  0x26   : > { %391 = vmatprep.subr.bf16.mxu0 (!%p252_p9), %v639_v19  ;;  %v650_v26 = vld [vmem:[%s260_s7 + $0x40] ss:$8 sps:$4 sm:$0xff] (!%p252_p9)   ;;  %v651_v27 = vld [vmem:[%s260_s7 + $0x54] ss:$8 sps:$4 sm:$0xff] (!%p252_p9)   ;;  %v653_v28 = vld [vmem:[%s260_s7 + $0x50] ss:$8 sps:$4 sm:$0xff] (!%p252_p9)  }
  0x27   : > { %v654_v29 = vld [vmem:[%s260_s7 + $0x64] ss:$8 sps:$4 sm:$0xff] (!%p252_p9)   ;;  %v656_v30 = vld [vmem:[%s260_s7 + $0x60] ss:$8 sps:$4 sm:$0xff] (!%p252_p9)   ;;  %v657_v31 = vld [vmem:[%s260_s7 + $0x74] ss:$8 sps:$4 sm:$0xff] (!%p252_p9)  }
  0x28   : > { %v659_v32 = vld [vmem:[%s260_s7 + $0x70] ss:$8 sps:$4 sm:$0xff]   ;;  %s781_s11 = scalar_lea.vmem [#allocation3], %s584_s10  ;;  %vm440_vm0 = vcmask (!%p602_p10), 7168   ;;  %v686_v38 = vmov (!%p602_p10), 0.0  }
  0x29   : > { %392 = vmatpush1.bf16.msra.mxu0 %v641_v20  ;;  %441 = vst.msk [vmem:[%s847_s3] sm:$0xff] (!%p602_p10), %vm440_vm0, %v686_v38  ;;  %442 = vst.msk [vmem:[%s847_s3 + $0x8] sm:$0xff] (!%p602_p10), %vm440_vm0, %v686_v38 }
  0x2a   : > { %393 = vmatprep.subr.bf16.mxu0 %v642_v21  ;;  %443 = vst.msk [vmem:[%s848_s4] sm:$0xff] (!%p602_p10), %vm440_vm0, %v686_v38  ;;  %444 = vst.msk [vmem:[%s848_s4 + $0x8] sm:$0xff] (!%p602_p10), %vm440_vm0, %v686_v38 }
  0x2d   : > { %394 = vmatpush1.bf16.msra.mxu0 %v644_v22 }
  0x2e   : > { %395 = vmatprep.subr.bf16.mxu0 %v645_v23 }
  0x31   : > { %396 = vmatpush1.bf16.msra.mxu0 %v647_v24 }
  0x32   : > { %397 = vmatprep.subr.bf16.mxu0 %v648_v25 }
  0x35   : > { %398 = vmatpush1.bf16.msra.mxu0 %v650_v26 }
  0x36   : > { %399 = vmatprep.subr.bf16.mxu0 %v651_v27 }
  0x39   : > { %400 = vmatpush1.bf16.msra.mxu0 %v653_v28 }
  0x3a   : > { %401 = vmatprep.subr.bf16.mxu0 %v654_v29 }
  0x3d   : > { %402 = vmatpush1.bf16.msra.mxu0 %v656_v30 }
  0x3e   : > { %403 = vmatprep.subr.bf16.mxu0 %v657_v31 }
  0x41   : > { %404 = vmatpush1.bf16.msra.mxu0 %v659_v32 }
  0x44   : > { %422 = vmatmul.mubr.bf16.vlgmr.msra.gmra.mrb[0].mxu0 %v660_v33 }
 0x115   : > { %439 = sbr.rel (%p602_p10) target bundleno = 284 (0x11c), region = 70 }
 0x117   : > { %v423_v34 = vpop.f32.mrb[0].mxu0 }
 0x118   : > { %432 = vst [vmem:[%s781_s11] sm:$0xff] %v423_v34  ;;  %v425_v35 = vpop.f32.mrb[1].mxu0 }
 0x119   : > { %433 = vst [vmem:[%s781_s11 + $0x8] sm:$0xff] %v425_v35  ;;  %v427_v36 = vpop.f32.mrb[2].mxu0 }
 0x11a   : > { %434 = vst [vmem:[%s781_s11 + $0x10] sm:$0xff] %v427_v36  ;;  %v429_v37 = vpop.f32.mrb[3].mxu0 }
 0x11b   : > { %435 = vst [vmem:[%s781_s11 + $0x18] sm:$0xff] %v429_v37 }
 0x11c PF: > { %v460_v39 = vmul.f32 %v423_v34, %v423_v34  ;;  %v461_v40 = vmul.f32 %v425_v35, %v425_v35  ;;  %v447_v41 = vadd.f32 %v425_v35, %v423_v34  ;;  %v462_v42 = vmul.f32 %v427_v36, %v427_v36  ;;  %v445_v47 = vld [vmem:[%s847_s3] sm:$0xff]  ;;  %v446_v52 = vld [vmem:[%s847_s3 + $0x8] sm:$0xff]  ;;  %s609_s17 = sshll.u32 (%p743_p5), %s728_s18, 4 }
 0x11d   : > { %v463_v43 = vmul.f32 %v429_v37, %v429_v37  ;;  %v450_v45 = vadd.f32 %v429_v37, %v427_v36  ;;  %vm455_vm1 = vcmask 7168   ;;  %v458_v48 = vld [vmem:[%s848_s4] sm:$0xff]  ;;  %v459_v54 = vld [vmem:[%s848_s4 + $0x8] sm:$0xff]  ;;  %s483_s24 = scalar_lea.vmem (%p743_p5), %s846_s2, %s609_s17 }
 0x11e   : > { %v464_v44 = vadd.f32 %v461_v40, %v460_v39  ;;  %448 = vadd.xlane.f32.xlu0 %v447_v41 }
 0x11f   : > { %v467_v46 = vadd.f32 %v463_v43, %v462_v42  ;;  %v496_v59 = vld [vmem:[%s781_s11] sm:$0xff] (%p743_p5) }
 0x120   : > { %465 = vadd.xlane.f32.xlu1 %v464_v44  ;;  %v498_v60 = vld [vmem:[%s781_s11 + $0x8] sm:$0xff] (%p743_p5)  ;;  %497 = vst [vmem:[%s483_s24] sm:$0xff] (%p743_p5), %v496_v59 }
 0x121   : > { %v500_v61 = vld [vmem:[%s781_s11 + $0x10] sm:$0xff] (%p743_p5)  ;;  %499 = vst [vmem:[%s483_s24 + $0x8] sm:$0xff] (%p743_p5), %v498_v60 }
 0x122   : > { %451 = vadd.xlane.f32.xlu0 %v450_v45  ;;  %v502_v62 = vld [vmem:[%s781_s11 + $0x18] sm:$0xff] (%p743_p5)  ;;  %501 = vst [vmem:[%s483_s24 + $0x20] sm:$0xff] (%p743_p5), %v500_v61 }
 0x123   : > { %503 = vst [vmem:[%s483_s24 + $0x28] sm:$0xff] (%p743_p5), %v502_v62 }
 0x124   : > { %468 = vadd.xlane.f32.xlu1 %v467_v46 }
 0x1ab   : > { %v449_v49 = vpop.xlane.xlu0 %448 }
 0x1ac   : > { %v453_v50 = vadd.f32 %v449_v49, %v445_v47 }
 0x1ad   : > { %v466_v51 = vpop.xlane.xlu1 %465 }
 0x1ae   : > { %v470_v53 = vadd.f32 %v466_v51, %v458_v48  ;;  %456 = vst.msk [vmem:[%s847_s3] sm:$0xff] %vm455_vm1, %v453_v50  ;;  %480 = sbr.rel (!%p743_p5) target bundleno = 437 (0x1b5), region = 74 }
 0x1af   : > { %v452_v55 = vpop.xlane.xlu0 %451 }
 0x1b0   : > { %472 = vst.msk [vmem:[%s848_s4] sm:$0xff] %vm455_vm1, %v470_v53  ;;  %v454_v56 = vadd.f32 %v452_v55, %v446_v52 }
 0x1b1   : > { %v469_v57 = vpop.xlane.xlu1 %468 }
 0x1b2   : > { %v471_v58 = vadd.f32 %v469_v57, %v459_v54  ;;  %457 = vst.msk [vmem:[%s847_s3 + $0x8] sm:$0xff] %vm455_vm1, %v454_v56 }
 0x1b4   : > { %473 = vst.msk [vmem:[%s848_s4 + $0x8] sm:$0xff] %vm455_vm1, %v471_v58 }
 0x1b5 PF: > { %p12_p11 = scmp.ge.s32.totalorder %s731_s19, 4   ;;  %s850_s15 = smov %s679_s16 }
 0x1b6   : > { %s851_s16 = smov %s741_s22  ;;  %s852_s17 = smov %s731_s19 }
 0x1b7   :  { %14 = sbr.rel (!%p12_p11) target bundleno = 2 (0x2), region = 144 }

// kernel: dis_forward.11
= control target key start
LH: loop header
LB: loop body
LE: loop exit
PB: predicated region body
PF: predicated region fallthrough
CT: control target
= control target key end

     0   :  { %vm224_vm0 = vcmask 7168   ;;  %v377_v20 = vmov 0.0   ;;  %s563_s1 = inlined_call_operand.vmem [shape: bf16[256,128], index: 1, kind: input, shape index: {}]   ;;  %s564_s0 = inlined_call_operand.vmem [shape: bf16[32,256], index: 0, kind: input, shape index: {}]   ;;  %s565_s3 = inlined_call_operand.vmem [shape: f32[32,1], index: 3, kind: output, shape index: {1}]   ;;  %s566_s2 = inlined_call_operand.vmem [shape: f32[32,128], index: 2, kind: output, shape index: {0}]   ;;  %s567_s4 = inlined_call_operand.vmem [shape: f32[32,1], index: 4, kind: output, shape index: {2}]  }
   0x1   :  { %v355_v0 = vld [vmem:[%s563_s1 + $0x40] sm:$0xff]   ;;  %v357_v2 = vld [vmem:[%s563_s1 + $0x48] sm:$0xff]   ;;  %v359_v4 = vld [vmem:[%s563_s1 + $0x50] sm:$0xff]   ;;  %227 = vst.msk [vmem:[%s565_s3 + $0x10] sm:$0xff] %vm224_vm0, %v377_v20 }
   0x2   :  { %v356_v1 = vld [vmem:[%s563_s1] sm:$0xff]   ;;  %310 = vmatprep.subr.bf16.mxu0 %v355_v0  ;;  %338 = vmatprep.subr.bf16.mxu1 %v355_v0  ;;  %v358_v3 = vld [vmem:[%s563_s1 + $0x8] sm:$0xff]   ;;  %v360_v5 = vld [vmem:[%s563_s1 + $0x10] sm:$0xff]   ;;  %225 = vst.msk [vmem:[%s565_s3] sm:$0xff] %vm224_vm0, %v377_v20 }
   0x3   :  { %311 = vmatpush3.bf16.msra.mxu0 %v356_v1  ;;  %346 = vmatpush3.bf16.msra.mxu1 %v356_v1  ;;  %v361_v6 = vld [vmem:[%s563_s1 + $0x58] sm:$0xff]   ;;  %v363_v8 = vld [vmem:[%s563_s1 + $0x60] sm:$0xff]   ;;  %v365_v10 = vld [vmem:[%s563_s1 + $0x68] sm:$0xff]   ;;  %226 = vst.msk [vmem:[%s565_s3 + $0x8] sm:$0xff] %vm224_vm0, %v377_v20 }
   0x4   :  { %312 = vmatprep.subr.bf16.mxu0 %v357_v2  ;;  %339 = vmatprep.subr.bf16.mxu1 %v357_v2  ;;  %v362_v7 = vld [vmem:[%s563_s1 + $0x18] sm:$0xff]   ;;  %v364_v9 = vld [vmem:[%s563_s1 + $0x20] sm:$0xff]   ;;  %v366_v13 = vld [vmem:[%s563_s1 + $0x28] sm:$0xff]   ;;  %228 = vst.msk [vmem:[%s565_s3 + $0x18] sm:$0xff] %vm224_vm0, %v377_v20 }
   0x5   :  { %v373_v11 = vld [vmem:[%s564_s0 + $0x4] ss:$8 sps:$4 sm:$0xff]   ;;  %v376_v12 = vld [vmem:[%s564_s0 + $0x14] ss:$8 sps:$4 sm:$0xff]   ;;  %v371_v18 = vld [vmem:[%s564_s0] ss:$8 sps:$4 sm:$0xff]  }
   0x6   :  { %v367_v14 = vld [vmem:[%s563_s1 + $0x70] sm:$0xff]   ;;  %199 = vmatprep.mubr.bf16.mxu0 %v373_v11  ;;  %207 = vmatprep.mubr.bf16.mxu1 %v376_v12  ;;  %v369_v16 = vld [vmem:[%s563_s1 + $0x78] sm:$0xff]   ;;  %230 = vst.msk [vmem:[%s567_s4 + $0x8] sm:$0xff] %vm224_vm0, %v377_v20  ;;  %229 = vst.msk [vmem:[%s567_s4] sm:$0xff] %vm224_vm0, %v377_v20 }
   0x7   :  { %313 = vmatpush3.bf16.msra.mxu0 %v358_v3  ;;  %347 = vmatpush3.bf16.msra.mxu1 %v358_v3  ;;  %v368_v15 = vld [vmem:[%s563_s1 + $0x30] sm:$0xff]   ;;  %v370_v17 = vld [vmem:[%s563_s1 + $0x38] sm:$0xff]   ;;  %231 = vst.msk [vmem:[%s567_s4 + $0x10] sm:$0xff] %vm224_vm0, %v377_v20  ;;  %232 = vst.msk [vmem:[%s567_s4 + $0x18] sm:$0xff] %vm224_vm0, %v377_v20 }
   0x8   :  { %314 = vmatprep.subr.bf16.mxu0 %v359_v4  ;;  %340 = vmatprep.subr.bf16.mxu1 %v359_v4  ;;  %v374_v19 = vld [vmem:[%s564_s0 + $0x10] ss:$8 sps:$4 sm:$0xff]  }
   0x9   :  { %v235_v37 = vld [vmem:[%s565_s3 + $0x10] sm:$0xff]  ;;  %v233_v38 = vld [vmem:[%s565_s3] sm:$0xff] }
   0xa   :  { %v234_v44 = vld [vmem:[%s565_s3 + $0x8] sm:$0xff] }
   0xb   :  { %315 = vmatpush3.bf16.msra.mxu0 %v360_v5  ;;  %348 = vmatpush3.bf16.msra.mxu1 %v360_v5  ;;  %v236_v43 = vld [vmem:[%s565_s3 + $0x18] sm:$0xff] }
   0xc   :  { %316 = vmatprep.subr.bf16.mxu0 %v361_v6  ;;  %341 = vmatprep.subr.bf16.mxu1 %v361_v6 }
   0xd   :  { %v255_v49 = vld [vmem:[%s567_s4 + $0x8] sm:$0xff]  ;;  %v254_v50 = vld [vmem:[%s567_s4] sm:$0xff] }
   0xe   :  { %v257_v55 = vld [vmem:[%s567_s4 + $0x18] sm:$0xff]  ;;  %v256_v56 = vld [vmem:[%s567_s4 + $0x10] sm:$0xff] }
   0xf   :  { %317 = vmatpush3.bf16.msra.mxu0 %v362_v7  ;;  %349 = vmatpush3.bf16.msra.mxu1 %v362_v7 }
  0x10   :  { %318 = vmatprep.subr.bf16.mxu0 %v363_v8  ;;  %342 = vmatprep.subr.bf16.mxu1 %v363_v8 }
  0x13   :  { %319 = vmatpush3.bf16.msra.mxu0 %v364_v9  ;;  %350 = vmatpush3.bf16.msra.mxu1 %v364_v9 }
  0x14   :  { %320 = vmatprep.subr.bf16.mxu0 %v365_v10  ;;  %343 = vmatprep.subr.bf16.mxu1 %v365_v10 }
  0x17   :  { %321 = vmatpush3.bf16.msra.mxu0 %v366_v13  ;;  %351 = vmatpush3.bf16.msra.mxu1 %v366_v13 }
  0x18   :  { %322 = vmatprep.subr.bf16.mxu0 %v367_v14  ;;  %344 = vmatprep.subr.bf16.mxu1 %v367_v14 }
  0x1b   :  { %323 = vmatpush3.bf16.msra.mxu0 %v368_v15  ;;  %352 = vmatpush3.bf16.msra.mxu1 %v368_v15 }
  0x1c   :  { %324 = vmatprep.subr.bf16.mxu0 %v369_v16  ;;  %345 = vmatprep.subr.bf16.mxu1 %v369_v16 }
  0x1f   :  { %325 = vmatpush3.bf16.msra.mxu0 %v370_v17  ;;  %353 = vmatpush3.bf16.msra.mxu1 %v370_v17 }
  0x22   :  { %200 = vmatmul.mubr.bf16.vlgmr.msra.gmra.mrb[0].mxu0 %v371_v18  ;;  %208 = vmatmul.mubr.bf16.vlgmr.msra.gmra.mrb[0].mxu1 %v374_v19 }
  0xf5   :  { %v326_v21 = vpop.f32.mrb[0].mxu0  ;;  %v332_v22 = vpop.f32.mrb[0].mxu1 }
  0xf6   :  { %v327_v23 = vpop.f32.mrb[1].mxu0  ;;  %v333_v24 = vpop.f32.mrb[1].mxu1 }
  0xf7   :  { %v328_v25 = vadd.f32 %v327_v23, %v326_v21  ;;  %v334_v26 = vadd.f32 %v333_v24, %v332_v22  ;;  %v329_v27 = vpop.f32.mrb[2].mxu0  ;;  %v335_v28 = vpop.f32.mrb[2].mxu1 }
  0xf8   :  { %v330_v29 = vpop.f32.mrb[3].mxu0  ;;  %v336_v30 = vpop.f32.mrb[3].mxu1 }
  0xf9   :  { %216 = vst [vmem:[%s566_s2] sm:$0xff] %v328_v25  ;;  %218 = vst [vmem:[%s566_s2 + $0x10] sm:$0xff] %v334_v26  ;;  %v331_v31 = vadd.f32 %v330_v29, %v329_v27  ;;  %v337_v32 = vadd.f32 %v336_v30, %v335_v28  ;;  %241 = vadd.xlane.f32.xlu1 %v334_v26  ;;  %237 = vadd.xlane.f32.xlu0 %v328_v25 }
  0xfa   :  { %v258_v34 = vmul.f32 %v328_v25, %v328_v25  ;;  %v260_v36 = vmul.f32 %v334_v26, %v334_v26 }
  0xfb   :  { %217 = vst [vmem:[%s566_s2 + $0x8] sm:$0xff] %v331_v31  ;;  %219 = vst [vmem:[%s566_s2 + $0x18] sm:$0xff] %v337_v32  ;;  %v259_v33 = vmul.f32 %v331_v31, %v331_v31  ;;  %v261_v35 = vmul.f32 %v337_v32, %v337_v32 }
  0xfd   :  { %243 = vadd.xlane.f32.xlu1 %v337_v32  ;;  %239 = vadd.xlane.f32.xlu0 %v331_v31 }
 0x101   :  { %264 = vadd.xlane.f32.xlu1 %v259_v33  ;;  %262 = vadd.xlane.f32.xlu0 %v258_v34 }
 0x105   :  { %268 = vadd.xlane.f32.xlu1 %v261_v35  ;;  %266 = vadd.xlane.f32.xlu0 %v260_v36 }
 0x186   :  { %v242_v39 = vpop.xlane.xlu1 %241  ;;  %v238_v40 = vpop.xlane.xlu0 %237 }
 0x187   :  { %v247_v41 = vadd.f32 %v242_v39, %v235_v37  ;;  %v245_v42 = vadd.f32 %v238_v40, %v233_v38 }
 0x189   :  { %252 = vst.msk [vmem:[%s565_s3 + $0x10] sm:$0xff] %vm224_vm0, %v247_v41  ;;  %250 = vst.msk [vmem:[%s565_s3] sm:$0xff] %vm224_vm0, %v245_v42 }
 0x18a   :  { %v244_v45 = vpop.xlane.xlu1 %243  ;;  %v240_v46 = vpop.xlane.xlu0 %239 }
 0x18b   :  { %v248_v47 = vadd.f32 %v244_v45, %v236_v43  ;;  %v246_v48 = vadd.f32 %v240_v46, %v234_v44 }
 0x18d   :  { %253 = vst.msk [vmem:[%s565_s3 + $0x18] sm:$0xff] %vm224_vm0, %v248_v47  ;;  %251 = vst.msk [vmem:[%s565_s3 + $0x8] sm:$0xff] %vm224_vm0, %v246_v48 }
 0x18e   :  { %v265_v51 = vpop.xlane.xlu1 %264  ;;  %v263_v52 = vpop.xlane.xlu0 %262 }
 0x18f   :  { %v271_v53 = vadd.f32 %v265_v51, %v255_v49  ;;  %v270_v54 = vadd.f32 %v263_v52, %v254_v50 }
 0x191   :  { %275 = vst.msk [vmem:[%s567_s4 + $0x8] sm:$0xff] %vm224_vm0, %v271_v53  ;;  %274 = vst.msk [vmem:[%s567_s4] sm:$0xff] %vm224_vm0, %v270_v54 }
 0x192   :  { %v269_v57 = vpop.xlane.xlu1 %268  ;;  %v267_v58 = vpop.xlane.xlu0 %266 }
 0x193   :  { %v273_v59 = vadd.f32 %v269_v57, %v257_v55  ;;  %v272_v60 = vadd.f32 %v267_v58, %v256_v56 }
 0x195   :  { %277 = vst.msk [vmem:[%s567_s4 + $0x18] sm:$0xff] %vm224_vm0, %v273_v59  ;;  %276 = vst.msk [vmem:[%s567_s4 + $0x10] sm:$0xff] %vm224_vm0, %v272_v60 }

// kernel: dis_forward.12
= control target key start
LH: loop header
LB: loop body
LE: loop exit
PB: predicated region body
PF: predicated region fallthrough
CT: control target
= control target key end

     0   :  { %v190_v0 = vmov 0   ;;  %s287_s1 = inlined_call_operand.vmem [shape: f32[32,1], index: 1, kind: input, shape index: {}]   ;;  %s288_s2 = inlined_call_operand.vmem [shape: f32[32,1], index: 2, kind: input, shape index: {}]   ;;  %s289_s3 = inlined_call_operand.vmem [shape: f32[32,1], index: 3, kind: input, shape index: {}]   ;;  %s290_s4 = inlined_call_operand.vmem [shape: f32[32,1], index: 4, kind: input, shape index: {}]   ;;  %s291_s0 = inlined_call_operand.vmem [shape: f32[32,128], index: 0, kind: input, shape index: {}]   ;;  %s292_s5 = inlined_call_operand.vmem [shape: bf16[32,128], index: 5, kind: output, shape index: {}]  }
   0x1   :  { %181 = vset.pattern.permute.xlu1 %v190_v0  ;;  %180 = vset.pattern.permute.xlu0 %v190_v0  ;;  %v22_v1 = vld [vmem:[%s287_s1 + $0x10] sm:$0xff]  ;;  %v23_v2 = vld [vmem:[%s287_s1 + $0x18] sm:$0xff]  ;;  %v21_v7 = vld [vmem:[%s287_s1 + $0x8] sm:$0xff] }
   0x2   :  { %v30_v3 = vld [vmem:[%s288_s2 + $0x10] sm:$0xff]  ;;  %v26_v4 = vmul.f32 0.0078125, %v22_v1  ;;  %v27_v5 = vmul.f32 0.0078125, %v23_v2  ;;  %v20_v8 = vld [vmem:[%s287_s1] sm:$0xff]  ;;  %v25_v9 = vmul.f32 0.0078125, %v21_v7  ;;  %v31_v12 = vld [vmem:[%s288_s2 + $0x18] sm:$0xff] }
   0x3   :  { %v34_v6 = vmul.f32 0.0078125, %v30_v3  ;;  %v24_v10 = vmul.f32 0.0078125, %v20_v8  ;;  %v28_v11 = vld [vmem:[%s288_s2] sm:$0xff]  ;;  %v35_v16 = vmul.f32 0.0078125, %v31_v12  ;;  %v29_v17 = vld [vmem:[%s288_s2 + $0x8] sm:$0xff]  ;;  %v46_v29 = vld [vmem:[%s289_s3 + $0x10] sm:$0xff] }
   0x4   :  { %v38_v13 = vmul.f32 %v26_v4, %v26_v4  ;;  %v39_v14 = vmul.f32 %v27_v5, %v27_v5  ;;  %v32_v15 = vmul.f32 0.0078125, %v28_v11  ;;  %v37_v18 = vmul.f32 %v25_v9, %v25_v9  ;;  %v44_v30 = vld [vmem:[%s289_s3] sm:$0xff]  ;;  %v47_v32 = vld [vmem:[%s289_s3 + $0x18] sm:$0xff]  ;;  %v45_v35 = vld [vmem:[%s289_s3 + $0x8] sm:$0xff] }
   0x5   :  { %v36_v19 = vmul.f32 %v24_v10, %v24_v10  ;;  %v33_v20 = vmul.f32 0.0078125, %v29_v17  ;;  %v61_v42 = vld [vmem:[%s290_s4 + $0x8] sm:$0xff]  ;;  %v60_v43 = vld [vmem:[%s290_s4] sm:$0xff]  ;;  %v63_v49 = vld [vmem:[%s290_s4 + $0x18] sm:$0xff] }
   0x6   :  { %v42_v21 = vsub.f32 %v34_v6, %v38_v13  ;;  %v43_v22 = vsub.f32 %v35_v16, %v39_v14  ;;  %v62_v50 = vld [vmem:[%s290_s4 + $0x10] sm:$0xff]  ;;  %v73_v56 = vld [vmem:[%s291_s0 + $0x8] sm:$0xff]  ;;  %v72_v57 = vld [vmem:[%s291_s0] sm:$0xff] }
   0x7   :  { %v40_v23 = vsub.f32 %v32_v15, %v36_v19  ;;  %v41_v24 = vsub.f32 %v33_v20, %v37_v18  ;;  %v75_v61 = vld [vmem:[%s291_s0 + $0x18] sm:$0xff]  ;;  %v74_v63 = vld [vmem:[%s291_s0 + $0x10] sm:$0xff] }
   0x8   :  { %v50_v25 = vadd.f32 1e-05, %v42_v21  ;;  %v51_v26 = vadd.f32 1e-05, %v43_v22 }
   0x9   :  { %v48_v27 = vadd.f32 1e-05, %v40_v23  ;;  %v49_v28 = vadd.f32 1e-05, %v41_v24 }
   0xa   :  { %182 = vrsqrt.f32 %v50_v25 }
   0xb   :  { %184 = vrsqrt.f32 %v48_v27 }
   0xc   :  { %186 = vrsqrt.f32 %v51_v26 }
   0xd   :  { %188 = vrsqrt.f32 %v49_v28 }
  0x14   :  { %v183_v31 = vpop.eup %182 }
  0x15   :  { %v185_v33 = vpop.eup %184  ;;  %v58_v34 = vmul.f32 %v183_v31, %v46_v29 }
  0x16   :  { %v187_v36 = vpop.eup %186  ;;  %v56_v37 = vmul.f32 %v185_v33, %v44_v30 }
  0x17   :  { %v189_v38 = vpop.eup %188  ;;  %88 = vperm.xlu1 %181, %v58_v34   ;;  %v59_v39 = vmul.f32 %v187_v36, %v47_v32  ;;  %v66_v46 = vmul.f32 %v58_v34, %v26_v4 }
  0x18   :  { %78 = vperm.xlu0 %180, %v56_v37   ;;  %v64_v40 = vmul.f32 %v56_v37, %v24_v10  ;;  %v57_v41 = vmul.f32 %v189_v38, %v45_v35 }
  0x19   :  { %v67_v45 = vmul.f32 %v59_v39, %v27_v5  ;;  %v70_v52 = vsub.f32 %v62_v50, %v66_v46 }
  0x1a   :  { %v65_v44 = vmul.f32 %v57_v41, %v25_v9  ;;  %v68_v48 = vsub.f32 %v60_v43, %v64_v40 }
  0x1b   :  { %93 = vperm.xlu1 %181, %v59_v39   ;;  %v71_v51 = vsub.f32 %v63_v49, %v67_v45 }
  0x1c   :  { %83 = vperm.xlu0 %180, %v57_v41   ;;  %v69_v47 = vsub.f32 %v61_v42, %v65_v44 }
  0x1f   :  { %107 = vperm.xlu1 %181, %v69_v47  }
  0x20   :  { %102 = vperm.xlu0 %180, %v68_v48  }
  0x23   :  { %117 = vperm.xlu1 %181, %v71_v51  }
  0x24   :  { %112 = vperm.xlu0 %180, %v70_v52  }
  0x96   :  { %v89_v53 = vpop.permute.xlu1 %88 }
  0x97   :  { %v79_v54 = vpop.permute.xlu0 %78  ;;  %v98_v5 = vmul.f32 %v89_v53, %v74_v63 }
  0x98   :  { %v96_v60 = vmul.f32 %v79_v54, %v72_v57 }
  0x9a   :  { %v94_v55 = vpop.permute.xlu1 %93 }
  0x9b   :  { %v84_v58 = vpop.permute.xlu0 %83  ;;  %v99_v3 = vmul.f32 %v94_v55, %v75_v61 }
  0x9c   :  { %v97_v59 = vmul.f32 %v84_v58, %v73_v56 }
  0x9e   :  { %v108_v62 = vpop.permute.xlu1 %107 }
  0x9f   :  { %v121_v0 = vadd.f32 %v108_v62, %v97_v59  ;;  %v103_v1 = vpop.permute.xlu0 %102 }
  0xa0   :  { %v120_v2 = vadd.f32 %v103_v1, %v96_v60 }
  0xa1   :  { %vm125_vm0 = vcmp.ge.f32.partialorder %v121_v0, 0.0  ;;  %v129_v4 = vmul.f32 0.2, %v121_v0 }
  0xa2   :  { %vm124_vm1 = vcmp.ge.f32.partialorder %v120_v2, 0.0  ;;  %v128_v6 = vmul.f32 0.2, %v120_v2  ;;  %v118_v7 = vpop.permute.xlu1 %117 }
  0xa3   :  { %v133_v8 = vsel %vm125_vm0, %v121_v0, %v129_v4  ;;  %v123_v9 = vadd.f32 %v118_v7, %v99_v3  ;;  %v113_v10 = vpop.permute.xlu0 %112 }
  0xa4   :  { %v132_v11 = vsel %vm124_vm1, %v120_v2, %v128_v6  ;;  %v122_v12 = vadd.f32 %v113_v10, %v98_v5 }
  0xa5   :  { %v171_v13 = vpack.c.bf16 %v133_v8, %v132_v11  ;;  %vm127_vm2 = vcmp.ge.f32.partialorder %v123_v9, 0.0  ;;  %v131_v14 = vmul.f32 0.2, %v123_v9 }
  0xa6   :  { %vm126_vm3 = vcmp.ge.f32.partialorder %v122_v12, 0.0  ;;  %v130_v15 = vmul.f32 0.2, %v122_v12 }
  0xa7   :  { %172 = vst [vmem:[%s292_s5] sm:$0xff] %v171_v13   ;;  %v135_v16 = vsel %vm127_vm2, %v123_v9, %v131_v14 }
  0xa8   :  { %v134_v17 = vsel %vm126_vm3, %v122_v12, %v130_v15 }
  0xa9   :  { %v176_v18 = vpack.c.bf16 %v135_v16, %v134_v17 }
  0xab   :  { %178 = vst [vmem:[%s292_s5 + $0x8] sm:$0xff] %v176_v18  }

// kernel: dis_forward.13
= control target key start
LH: loop header
LB: loop body
LE: loop exit
PB: predicated region body
PF: predicated region fallthrough
CT: control target
= control target key end

     0   :  { %vm426_vm0 = vcmask 7168   ;;  %v641_v40 = vmov 0.0   ;;  %vm417_vm1 = vcmask 801792   ;;  %s899_s1 = inlined_call_operand.vmem [shape: bf16[512,98], index: 1, kind: input, shape index: {}]   ;;  %s900_s0 = inlined_call_operand.vmem [shape: bf16[32,512], index: 0, kind: input, shape index: {}]   ;;  %s901_s3 = inlined_call_operand.vmem [shape: f32[32,1], index: 3, kind: output, shape index: {1}]   ;;  %s902_s2 = inlined_call_operand.vmem [shape: f32[32,98], index: 2, kind: output, shape index: {0}]   ;;  %s903_s4 = inlined_call_operand.vmem [shape: f32[32,1], index: 4, kind: output, shape index: {2}]  }
   0x1   :  { %v597_v0 = vld [vmem:[%s899_s1 + $0x40] sm:$0xff]   ;;  %v601_v4 = vld [vmem:[%s899_s1 + $0x48] sm:$0xff]   ;;  %v605_v8 = vld [vmem:[%s899_s1 + $0x50] sm:$0xff]   ;;  %427 = vst.msk [vmem:[%s901_s3] sm:$0xff] %vm426_vm0, %v641_v40 }
   0x2   :  { %v598_v1 = vld [vmem:[%s899_s1 + $0xc0] sm:$0xff]   ;;  %540 = vmatprep.subr.bf16.mxu0 %v597_v0  ;;  %v602_v5 = vld [vmem:[%s899_s1 + $0xc8] sm:$0xff]   ;;  %v606_v9 = vld [vmem:[%s899_s1 + $0xd0] sm:$0xff]   ;;  %428 = vst.msk [vmem:[%s901_s3 + $0x8] sm:$0xff] %vm426_vm0, %v641_v40 }
   0x3   :  { %v599_v2 = vld [vmem:[%s899_s1] sm:$0xff]   ;;  %568 = vmatprep.subr.bf16.mxu1 %v598_v1  ;;  %v603_v6 = vld [vmem:[%s899_s1 + $0x8] sm:$0xff]   ;;  %v607_v10 = vld [vmem:[%s899_s1 + $0x10] sm:$0xff]   ;;  %429 = vst.msk [vmem:[%s901_s3 + $0x10] sm:$0xff] %vm426_vm0, %v641_v40 }
   0x4   :  { %v600_v3 = vld [vmem:[%s899_s1 + $0x80] sm:$0xff]   ;;  %541 = vmatpush3.bf16.msra.mxu0 %v599_v2  ;;  %v604_v7 = vld [vmem:[%s899_s1 + $0x88] sm:$0xff]   ;;  %v608_v11 = vld [vmem:[%s899_s1 + $0x90] sm:$0xff]   ;;  %430 = vst.msk [vmem:[%s901_s3 + $0x18] sm:$0xff] %vm426_vm0, %v641_v40 }
   0x5   :  { %569 = vmatpush3.bf16.msra.mxu1 %v600_v3  ;;  %542 = vmatprep.subr.bf16.mxu0 %v601_v4  ;;  %v609_v12 = vld [vmem:[%s899_s1 + $0x58] sm:$0xff]   ;;  %v613_v16 = vld [vmem:[%s899_s1 + $0x60] sm:$0xff]   ;;  %v617_v20 = vld [vmem:[%s899_s1 + $0x68] sm:$0xff]   ;;  %432 = vst.msk [vmem:[%s903_s4 + $0x8] sm:$0xff] %vm426_vm0, %v641_v40 }
   0x6   :  { %570 = vmatprep.subr.bf16.mxu1 %v602_v5  ;;  %v610_v13 = vld [vmem:[%s899_s1 + $0xd8] sm:$0xff]   ;;  %v614_v17 = vld [vmem:[%s899_s1 + $0xe0] sm:$0xff]   ;;  %v618_v21 = vld [vmem:[%s899_s1 + $0xe8] sm:$0xff]   ;;  %431 = vst.msk [vmem:[%s903_s4] sm:$0xff] %vm426_vm0, %v641_v40 }
   0x7   :  { %v611_v14 = vld [vmem:[%s899_s1 + $0x18] sm:$0xff]   ;;  %v615_v18 = vld [vmem:[%s899_s1 + $0x20] sm:$0xff]   ;;  %v619_v22 = vld [vmem:[%s899_s1 + $0x28] sm:$0xff]   ;;  %433 = vst.msk [vmem:[%s903_s4 + $0x10] sm:$0xff] %vm426_vm0, %v641_v40 }
   0x8   :  { %543 = vmatpush3.bf16.msra.mxu0 %v603_v6  ;;  %v612_v15 = vld [vmem:[%s899_s1 + $0x98] sm:$0xff]   ;;  %v616_v19 = vld [vmem:[%s899_s1 + $0xa0] sm:$0xff]   ;;  %v620_v23 = vld [vmem:[%s899_s1 + $0xa8] sm:$0xff]   ;;  %434 = vst.msk [vmem:[%s903_s4 + $0x18] sm:$0xff] %vm426_vm0, %v641_v40 }
   0x9   :  { %571 = vmatpush3.bf16.msra.mxu1 %v604_v7  ;;  %544 = vmatprep.subr.bf16.mxu0 %v605_v8  ;;  %v621_v24 = vld [vmem:[%s899_s1 + $0x70] sm:$0xff]   ;;  %v625_v28 = vld [vmem:[%s899_s1 + $0x78] sm:$0xff]  }
   0xa   :  { %572 = vmatprep.subr.bf16.mxu1 %v606_v9  ;;  %v622_v25 = vld [vmem:[%s899_s1 + $0xf0] sm:$0xff]   ;;  %v626_v29 = vld [vmem:[%s899_s1 + $0xf8] sm:$0xff]  }
   0xb   :  { %v623_v26 = vld [vmem:[%s899_s1 + $0x30] sm:$0xff]   ;;  %v627_v30 = vld [vmem:[%s899_s1 + $0x38] sm:$0xff]  }
   0xc   :  { %545 = vmatpush3.bf16.msra.mxu0 %v607_v10  ;;  %v624_v27 = vld [vmem:[%s899_s1 + $0xb0] sm:$0xff]   ;;  %v628_v31 = vld [vmem:[%s899_s1 + $0xb8] sm:$0xff]  }
   0xd   :  { %573 = vmatpush3.bf16.msra.mxu1 %v608_v11  ;;  %546 = vmatprep.subr.bf16.mxu0 %v609_v12  ;;  %v629_v32 = vld [vmem:[%s900_s0] ss:$16 sps:$4 sm:$0xff]   ;;  %v631_v33 = vld [vmem:[%s900_s0 + $0x4] ss:$16 sps:$4 sm:$0xff]   ;;  %v632_v34 = vld [vmem:[%s900_s0 + $0x8] ss:$16 sps:$4 sm:$0xff]  }
   0xe   :  { %574 = vmatprep.subr.bf16.mxu1 %v610_v13  ;;  %v634_v35 = vld [vmem:[%s900_s0 + $0xc] ss:$16 sps:$4 sm:$0xff]   ;;  %351 = vmatprep.mubr.bf16.mxu0 %v631_v33  ;;  %v635_v36 = vld [vmem:[%s900_s0 + $0x24] ss:$16 sps:$4 sm:$0xff]   ;;  %v639_v38 = vld [vmem:[%s900_s0 + $0x20] ss:$16 sps:$4 sm:$0xff]  }
   0xf   :  { %400 = vmatprep.mubr.bf16.mxu1 %v634_v35  ;;  %v637_v37 = vld [vmem:[%s900_s0 + $0x2c] ss:$16 sps:$4 sm:$0xff]   ;;  %v640_v39 = vld [vmem:[%s900_s0 + $0x28] ss:$16 sps:$4 sm:$0xff]   ;;  %v462_v33 = vld [vmem:[%s903_s4 + $0x10] sm:$0xff] }
  0x10   :  { %547 = vmatpush3.bf16.msra.mxu0 %v611_v14 }
  0x11   :  { %575 = vmatpush3.bf16.msra.mxu1 %v612_v15  ;;  %548 = vmatprep.subr.bf16.mxu0 %v613_v16 }
  0x12   :  { %576 = vmatprep.subr.bf16.mxu1 %v614_v17  ;;  %v435_v17 = vld [vmem:[%s901_s3] sm:$0xff] }
  0x14   :  { %549 = vmatpush3.bf16.msra.mxu0 %v615_v18 }
  0x15   :  { %577 = vmatpush3.bf16.msra.mxu1 %v616_v19  ;;  %550 = vmatprep.subr.bf16.mxu0 %v617_v20  ;;  %v461_v20 = vld [vmem:[%s903_s4 + $0x8] sm:$0xff] }
  0x16   :  { %578 = vmatprep.subr.bf16.mxu1 %v618_v21  ;;  %v436_v21 = vld [vmem:[%s901_s3 + $0x8] sm:$0xff] }
  0x18   :  { %551 = vmatpush3.bf16.msra.mxu0 %v619_v22 }
  0x19   :  { %579 = vmatpush3.bf16.msra.mxu1 %v620_v23  ;;  %552 = vmatprep.subr.bf16.mxu0 %v621_v24 }
  0x1a   :  { %580 = vmatprep.subr.bf16.mxu1 %v622_v25 }
  0x1c   :  { %553 = vmatpush3.bf16.msra.mxu0 %v623_v26  ;;  %v437_v26 = vld [vmem:[%s901_s3 + $0x10] sm:$0xff] }
  0x1d   :  { %581 = vmatpush3.bf16.msra.mxu1 %v624_v27  ;;  %554 = vmatprep.subr.bf16.mxu0 %v625_v28  ;;  %v460_v27 = vld [vmem:[%s903_s4] sm:$0xff] }
  0x1e   :  { %582 = vmatprep.subr.bf16.mxu1 %v626_v29 }
  0x20   :  { %555 = vmatpush3.bf16.msra.mxu0 %v627_v30 }
  0x21   :  { %583 = vmatpush3.bf16.msra.mxu1 %v628_v31 }
  0x23   :  { %352 = vmatmul.mubr.bf16.vlgmr.msra.gmra.mrb[0].mxu0 %v629_v32  ;;  %v438_v32 = vld [vmem:[%s901_s3 + $0x18] sm:$0xff] }
  0x24   :  { %401 = vmatmul.mubr.bf16.vlgmr.msra.gmra.mrb[0].mxu1 %v632_v34  ;;  %359 = vmatprep.mubr.bf16.mxu0 %v635_v36 }
  0x25   :  { %408 = vmatprep.mubr.bf16.mxu1 %v637_v37 }
  0x2b   :  { %360 = vmatmul.mubr.bf16.gmra.mrb[4].mxu0 %v639_v38  ;;  %v463_v38 = vld [vmem:[%s903_s4 + $0x18] sm:$0xff] }
  0x2c   :  { %409 = vmatmul.mubr.bf16.gmra.mrb[4].mxu1 %v640_v39 }
  0xf6   :  { %v556_v41 = vpop.f32.mrb[0].mxu0 }
  0xf7   :  { %v584_v42 = vpop.f32.mrb[0].mxu1  ;;  %v557_v43 = vpop.f32.mrb[1].mxu0 }
  0xf8   :  { %v558_v44 = vadd.f32 %v557_v43, %v556_v41  ;;  %v585_v45 = vpop.f32.mrb[1].mxu1  ;;  %v559_v46 = vpop.f32.mrb[2].mxu0 }
  0xf9   :  { %v586_v47 = vadd.f32 %v585_v45, %v584_v42  ;;  %v587_v48 = vpop.f32.mrb[2].mxu1  ;;  %v560_v49 = vpop.f32.mrb[3].mxu0 }
  0xfa   :  { %v561_v50 = vadd.f32 %v560_v49, %v559_v46  ;;  %v588_v51 = vpop.f32.mrb[3].mxu1 }
  0xfb   :  { %v403_v52 = vadd.f32 %v586_v47, %v558_v44  ;;  %v589_v53 = vadd.f32 %v588_v51, %v587_v48 }
  0xfd   :  { %418 = vst.msk [vmem:[%s902_s2] sm:$0xff] %vm417_vm1, %v403_v52  ;;  %v406_v54 = vadd.f32 %v589_v53, %v561_v50  ;;  %v439_v55 = vsel %vm417_vm1, %v403_v52, 0.0  ;;  %v464_v4 = vmul.f32 %v403_v52, %v403_v52 }
  0xfe   :  { %440 = vadd.xlane.f32.xlu0 %v439_v55  ;;  %v562_v56 = vpop.f32.mrb[4].mxu0 }
  0xff   :  { %419 = vst.msk [vmem:[%s902_s2 + $0x8] sm:$0xff] %vm417_vm1, %v406_v54  ;;  %v590_v57 = vpop.f32.mrb[4].mxu1  ;;  %v563_v58 = vpop.f32.mrb[5].mxu0  ;;  %v465_v59 = vmul.f32 %v406_v54, %v406_v54  ;;  %v442_v3 = vsel %vm417_vm1, %v406_v54, 0.0  ;;  %v468_v11 = vsel %vm417_vm1, %v464_v4, 0.0 }
 0x100   :  { %v564_v60 = vadd.f32 %v563_v58, %v562_v56  ;;  %v591_v61 = vpop.f32.mrb[5].mxu1  ;;  %v565_v62 = vpop.f32.mrb[6].mxu0 }
 0x101   :  { %v592_v63 = vadd.f32 %v591_v61, %v590_v57  ;;  %v593_v0 = vpop.f32.mrb[6].mxu1  ;;  %v566_v1 = vpop.f32.mrb[7].mxu0  ;;  %v471_v2 = vsel %vm417_vm1, %v465_v59, 0.0 }
 0x102   :  { %v567_v5 = vadd.f32 %v566_v1, %v565_v62  ;;  %v594_v6 = vpop.f32.mrb[7].mxu1  ;;  %472 = vadd.xlane.f32.xlu1 %v471_v2  ;;  %443 = vadd.xlane.f32.xlu0 %v442_v3 }
 0x103   :  { %v411_v7 = vadd.f32 %v592_v63, %v564_v60  ;;  %v595_v8 = vadd.f32 %v594_v6, %v593_v0 }
 0x105   :  { %420 = vst.msk [vmem:[%s902_s2 + $0x10] sm:$0xff] %vm417_vm1, %v411_v7  ;;  %v414_v9 = vadd.f32 %v595_v8, %v567_v5  ;;  %v445_v10 = vsel %vm417_vm1, %v411_v7, 0.0  ;;  %v466_v12 = vmul.f32 %v411_v7, %v411_v7 }
 0x106   :  { %446 = vadd.xlane.f32.xlu1 %v445_v10  ;;  %469 = vadd.xlane.f32.xlu0 %v468_v11 }
 0x107   :  { %421 = vst.msk [vmem:[%s902_s2 + $0x18] sm:$0xff] %vm417_vm1, %v414_v9  ;;  %v448_v13 = vsel %vm417_vm1, %v414_v9, 0.0  ;;  %v474_v14 = vsel %vm417_vm1, %v466_v12, 0.0  ;;  %v467_v15 = vmul.f32 %v414_v9, %v414_v9 }
 0x109   :  { %v477_v16 = vsel %vm417_vm1, %v467_v15, 0.0 }
 0x10a   :  { %449 = vadd.xlane.f32.xlu1 %v448_v13  ;;  %475 = vadd.xlane.f32.xlu0 %v474_v14 }
 0x10e   :  { %478 = vadd.xlane.f32.xlu1 %v477_v16 }
 0x18b   :  { %v441_v18 = vpop.xlane.xlu0 %440 }
 0x18c   :  { %v451_v19 = vadd.f32 %v441_v18, %v435_v17 }
 0x18e   :  { %456 = vst.msk [vmem:[%s901_s3] sm:$0xff] %vm426_vm0, %v451_v19 }
 0x18f   :  { %v473_v22 = vpop.xlane.xlu1 %472  ;;  %v444_v23 = vpop.xlane.xlu0 %443 }
 0x190   :  { %v481_v24 = vadd.f32 %v473_v22, %v461_v20  ;;  %v452_v25 = vadd.f32 %v444_v23, %v436_v21 }
 0x192   :  { %485 = vst.msk [vmem:[%s903_s4 + $0x8] sm:$0xff] %vm426_vm0, %v481_v24  ;;  %457 = vst.msk [vmem:[%s901_s3 + $0x8] sm:$0xff] %vm426_vm0, %v452_v25 }
 0x193   :  { %v447_v28 = vpop.xlane.xlu1 %446  ;;  %v470_v29 = vpop.xlane.xlu0 %469 }
 0x194   :  { %v453_v30 = vadd.f32 %v447_v28, %v437_v26  ;;  %v480_v31 = vadd.f32 %v470_v29, %v460_v27 }
 0x196   :  { %458 = vst.msk [vmem:[%s901_s3 + $0x10] sm:$0xff] %vm426_vm0, %v453_v30  ;;  %484 = vst.msk [vmem:[%s903_s4] sm:$0xff] %vm426_vm0, %v480_v31 }
 0x197   :  { %v450_v34 = vpop.xlane.xlu1 %449  ;;  %v476_v35 = vpop.xlane.xlu0 %475 }
 0x198   :  { %v454_v36 = vadd.f32 %v450_v34, %v438_v32  ;;  %v482_v37 = vadd.f32 %v476_v35, %v462_v33 }
 0x19a   :  { %459 = vst.msk [vmem:[%s901_s3 + $0x18] sm:$0xff] %vm426_vm0, %v454_v36  ;;  %486 = vst.msk [vmem:[%s903_s4 + $0x10] sm:$0xff] %vm426_vm0, %v482_v37 }
 0x19b   :  { %v479_v39 = vpop.xlane.xlu1 %478 }
 0x19c   :  { %v483_v40 = vadd.f32 %v479_v39, %v463_v38 }
 0x19e   :  { %487 = vst.msk [vmem:[%s903_s4 + $0x18] sm:$0xff] %vm426_vm0, %v483_v40 }

// kernel: dis_forward.14
= control target key start
LH: loop header
LB: loop body
LE: loop exit
PB: predicated region body
PF: predicated region fallthrough
CT: control target
= control target key end

     0   :  { %v180_v0 = vmov 0   ;;  %vm152_vm1 = vcmask 797696   ;;  %s287_s1 = inlined_call_operand.vmem [shape: f32[32,1], index: 1, kind: input, shape index: {}]   ;;  %s288_s2 = inlined_call_operand.vmem [shape: f32[32,1], index: 2, kind: input, shape index: {}]   ;;  %s289_s3 = inlined_call_operand.vmem [shape: f32[32,1], index: 3, kind: input, shape index: {}]   ;;  %s290_s4 = inlined_call_operand.vmem [shape: f32[32,1], index: 4, kind: input, shape index: {}]   ;;  %s291_s0 = inlined_call_operand.vmem [shape: f32[32,98], index: 0, kind: input, shape index: {}]   ;;  %s292_s5 = inlined_call_operand.vmem [shape: bf16[32,98], index: 5, kind: output, shape index: {}]  }
   0x1   :  { %171 = vset.pattern.permute.xlu1 %v180_v0  ;;  %170 = vset.pattern.permute.xlu0 %v180_v0  ;;  %v22_v1 = vld [vmem:[%s287_s1 + $0x10] sm:$0xff]  ;;  %v23_v2 = vld [vmem:[%s287_s1 + $0x18] sm:$0xff]  ;;  %v21_v7 = vld [vmem:[%s287_s1 + $0x8] sm:$0xff] }
   0x2   :  { %v30_v3 = vld [vmem:[%s288_s2 + $0x10] sm:$0xff]  ;;  %v26_v4 = vmul.f32 0.010204081, %v22_v1  ;;  %v27_v5 = vmul.f32 0.010204081, %v23_v2  ;;  %v20_v8 = vld [vmem:[%s287_s1] sm:$0xff] }
   0x3   :  { %v34_v6 = vmul.f32 0.010204081, %v30_v3  ;;  %v25_v11 = vmul.f32 0.010204081, %v21_v7  ;;  %v24_v12 = vmul.f32 0.010204081, %v20_v8 }
   0x4   :  { %v38_v9 = vmul.f32 %v26_v4, %v26_v4  ;;  %v39_v10 = vmul.f32 %v27_v5, %v27_v5  ;;  %v28_v13 = vld [vmem:[%s288_s2] sm:$0xff]  ;;  %v31_v15 = vld [vmem:[%s288_s2 + $0x18] sm:$0xff]  ;;  %v29_v16 = vld [vmem:[%s288_s2 + $0x8] sm:$0xff] }
   0x5   :  { %v32_v14 = vmul.f32 0.010204081, %v28_v13  ;;  %v37_v18 = vmul.f32 %v25_v11, %v25_v11  ;;  %v36_v19 = vmul.f32 %v24_v12, %v24_v12  ;;  %v35_v20 = vmul.f32 0.010204081, %v31_v15  ;;  %v46_v29 = vld [vmem:[%s289_s3 + $0x10] sm:$0xff]  ;;  %v44_v31 = vld [vmem:[%s289_s3] sm:$0xff] }
   0x6   :  { %v42_v17 = vsub.f32 %v34_v6, %v38_v9  ;;  %v33_v21 = vmul.f32 0.010204081, %v29_v16  ;;  %v47_v33 = vld [vmem:[%s289_s3 + $0x18] sm:$0xff]  ;;  %v45_v35 = vld [vmem:[%s289_s3 + $0x8] sm:$0xff]  ;;  %v60_v43 = vld [vmem:[%s290_s4] sm:$0xff] }
   0x7   :  { %v40_v23 = vsub.f32 %v32_v14, %v36_v19  ;;  %v43_v24 = vsub.f32 %v35_v20, %v39_v10  ;;  %v61_v42 = vld [vmem:[%s290_s4 + $0x8] sm:$0xff]  ;;  %v63_v46 = vld [vmem:[%s290_s4 + $0x18] sm:$0xff]  ;;  %v62_v50 = vld [vmem:[%s290_s4 + $0x10] sm:$0xff] }
   0x8   :  { %v50_v22 = vadd.f32 1e-05, %v42_v17  ;;  %v41_v25 = vsub.f32 %v33_v21, %v37_v18  ;;  %v73_v56 = vld [vmem:[%s291_s0 + $0x8] sm:$0xff]  ;;  %v72_v57 = vld [vmem:[%s291_s0] sm:$0xff]  ;;  %v75_v60 = vld [vmem:[%s291_s0 + $0x18] sm:$0xff] }
   0x9   :  { %v48_v26 = vadd.f32 1e-05, %v40_v23  ;;  %v51_v27 = vadd.f32 1e-05, %v43_v24  ;;  %v74_v62 = vld [vmem:[%s291_s0 + $0x10] sm:$0xff] }
   0xa   :  { %172 = vrsqrt.f32 %v50_v22  ;;  %v49_v28 = vadd.f32 1e-05, %v41_v25 }
   0xb   :  { %174 = vrsqrt.f32 %v48_v26 }
   0xc   :  { %176 = vrsqrt.f32 %v51_v27 }
   0xd   :  { %178 = vrsqrt.f32 %v49_v28 }
  0x14   :  { %v173_v30 = vpop.eup %172 }
  0x15   :  { %v58_v32 = vmul.f32 %v173_v30, %v46_v29  ;;  %v175_v34 = vpop.eup %174 }
  0x16   :  { %v177_v36 = vpop.eup %176  ;;  %v56_v37 = vmul.f32 %v175_v34, %v44_v31 }
  0x17   :  { %88 = vperm.xlu1 %171, %v58_v32   ;;  %v179_v38 = vpop.eup %178  ;;  %v59_v39 = vmul.f32 %v177_v36, %v47_v33  ;;  %v66_v47 = vmul.f32 %v58_v32, %v26_v4 }
  0x18   :  { %78 = vperm.xlu0 %170, %v56_v37   ;;  %v64_v40 = vmul.f32 %v56_v37, %v24_v12  ;;  %v57_v41 = vmul.f32 %v179_v38, %v45_v35 }
  0x19   :  { %v67_v45 = vmul.f32 %v59_v39, %v27_v5  ;;  %v70_v52 = vsub.f32 %v62_v50, %v66_v47 }
  0x1a   :  { %v65_v44 = vmul.f32 %v57_v41, %v25_v11  ;;  %v68_v49 = vsub.f32 %v60_v43, %v64_v40 }
  0x1b   :  { %93 = vperm.xlu1 %171, %v59_v39   ;;  %v71_v51 = vsub.f32 %v63_v46, %v67_v45 }
  0x1c   :  { %83 = vperm.xlu0 %170, %v57_v41   ;;  %v69_v48 = vsub.f32 %v61_v42, %v65_v44 }
  0x1f   :  { %107 = vperm.xlu1 %171, %v69_v48  }
  0x20   :  { %102 = vperm.xlu0 %170, %v68_v49  }
  0x23   :  { %117 = vperm.xlu1 %171, %v71_v51  }
  0x24   :  { %112 = vperm.xlu0 %170, %v70_v52  }
  0x96   :  { %v89_v53 = vpop.permute.xlu1 %88 }
  0x97   :  { %v79_v54 = vpop.permute.xlu0 %78  ;;  %v98_v5 = vmul.f32 %v89_v53, %v74_v62 }
  0x98   :  { %v96_v63 = vmul.f32 %v79_v54, %v72_v57 }
  0x9a   :  { %v94_v55 = vpop.permute.xlu1 %93 }
  0x9b   :  { %v84_v58 = vpop.permute.xlu0 %83  ;;  %v99_v2 = vmul.f32 %v94_v55, %v75_v60 }
  0x9c   :  { %v97_v59 = vmul.f32 %v84_v58, %v73_v56 }
  0x9e   :  { %v108_v61 = vpop.permute.xlu1 %107 }
  0x9f   :  { %v121_v0 = vadd.f32 %v108_v61, %v97_v59  ;;  %v103_v1 = vpop.permute.xlu0 %102 }
  0xa0   :  { %v120_v4 = vadd.f32 %v103_v1, %v96_v63 }
  0xa1   :  { %vm125_vm0 = vcmp.ge.f32.partialorder %v121_v0, 0.0  ;;  %v129_v3 = vmul.f32 0.2, %v121_v0 }
  0xa2   :  { %v118_v6 = vpop.permute.xlu1 %117  ;;  %vm124_vm2 = vcmp.ge.f32.partialorder %v120_v4, 0.0  ;;  %v128_v8 = vmul.f32 0.2, %v120_v4 }
  0xa3   :  { %v133_v7 = vsel %vm125_vm0, %v121_v0, %v129_v3  ;;  %v123_v9 = vadd.f32 %v118_v6, %v99_v2  ;;  %v113_v11 = vpop.permute.xlu0 %112 }
  0xa4   :  { %v166_v10 = vpack.c.bf16 %v133_v7, %v133_v7  ;;  %v132_v12 = vsel %vm124_vm2, %v120_v4, %v128_v8  ;;  %v122_v14 = vadd.f32 %v113_v11, %v98_v5 }
  0xa5   :  { %vm127_vm3 = vcmp.ge.f32.partialorder %v123_v9, 0.0  ;;  %v131_v13 = vmul.f32 0.2, %v123_v9  ;;  %v165_v15 = vpack.c.bf16 %v132_v12, %v132_v12 }
  0xa6   :  { %154 = vst.msk [vmem:[%s292_s5 + $0x4] sm:$0xf] %vm152_vm1, %v166_v10  ;;  %vm126_vm4 = vcmp.ge.f32.partialorder %v122_v14, 0.0  ;;  %v130_v17 = vmul.f32 0.2, %v122_v14 }
  0xa7   :  { %v135_v16 = vsel %vm127_vm3, %v123_v9, %v131_v13  ;;  %153 = vst.msk [vmem:[%s292_s5] sm:$0xf] %vm152_vm1, %v165_v15 }
  0xa8   :  { %v168_v18 = vpack.c.bf16 %v135_v16, %v135_v16  ;;  %v134_v19 = vsel %vm126_vm4, %v122_v14, %v130_v17 }
  0xa9   :  { %v167_v20 = vpack.c.bf16 %v134_v19, %v134_v19 }
  0xaa   :  { %156 = vst.msk [vmem:[%s292_s5 + $0xc] sm:$0xf] %vm152_vm1, %v168_v18 }
  0xab   :  { %155 = vst.msk [vmem:[%s292_s5 + $0x8] sm:$0xf] %vm152_vm1, %v167_v20 }

// kernel: dis_forward.15
= control target key start
LH: loop header
LB: loop body
LE: loop exit
PB: predicated region body
PF: predicated region fallthrough
CT: control target
= control target key end

     0   :  { %v511_v1 = vmov 0   ;;  %v88_v24 = vlaneseq  ;;  %v512_v25 = vmov 1966171168   ;;  %vm393_vm0 = vcmask 581632   ;;  %s638_s1 = inlined_call_operand.vmem [shape: bf16[512,72], index: 1, kind: input, shape index: {}]   ;;  %s639_s2 = inlined_call_operand.<no memory space> [shape: f32[1,1], index: 2, kind: input, shape index: {}]   ;;  %s640_s0 = inlined_call_operand.vmem [shape: bf16[1,512], index: 0, kind: input, shape index: {}]   ;;  %s641_s3 = inlined_call_operand.vmem [shape: f32[1,72], index: 3, kind: output, shape index: {}]  }
   0x1   :  { %v479_v0 = vld [vmem:[%s638_s1 + $0x40] sm:$0xff]   ;;  %478 = vset.pattern.permute.xlu0 %v511_v1  ;;  %v8_v2 = vstv %s639_s2  ;;  %v483_v6 = vld [vmem:[%s638_s1 + $0x48] sm:$0xff]   ;;  %v487_v10 = vld [vmem:[%s638_s1 + $0x50] sm:$0xff]   ;;  %v102_v26 = vunpack.c.l.s4 %v512_v25 }
   0x2   :  { %v480_v3 = vld [vmem:[%s638_s1 + $0xc0] sm:$0xff]   ;;  %9 = vst [vmem:[#allocation2] sm:$0x1] %v8_v2  ;;  %432 = vmatprep.subr.bf16.mxu0 %v479_v0  ;;  %v484_v7 = vld [vmem:[%s638_s1 + $0xc8] sm:$0xff]   ;;  %v488_v11 = vld [vmem:[%s638_s1 + $0xd0] sm:$0xff]   ;;  %v89_v31 = vshrl.u32 %v88_v24, 7 }
   0x3   :  { %v481_v4 = vld [vmem:[%s638_s1] sm:$0xff]   ;;  %454 = vmatprep.subr.bf16.mxu1 %v480_v3  ;;  %v485_v8 = vld [vmem:[%s638_s1 + $0x8] sm:$0xff]   ;;  %v489_v12 = vld [vmem:[%s638_s1 + $0x10] sm:$0xff]   ;;  %v103_v32 = vunpack.c.0.s8 %v102_v26 }
   0x4   :  { %v482_v5 = vld [vmem:[%s638_s1 + $0x80] sm:$0xff]   ;;  %433 = vmatpush3.bf16.msra.mxu0 %v481_v4  ;;  %v486_v9 = vld [vmem:[%s638_s1 + $0x88] sm:$0xff]   ;;  %v490_v13 = vld [vmem:[%s638_s1 + $0x90] sm:$0xff]   ;;  %v90_v47 = vsub.s32 0, %v89_v31 }
   0x5   :  { %455 = vmatpush3.bf16.msra.mxu1 %v482_v5  ;;  %434 = vmatprep.subr.bf16.mxu0 %v483_v6  ;;  %v491_v14 = vld [vmem:[%s638_s1 + $0x58] sm:$0xff]   ;;  %v495_v18 = vld [vmem:[%s638_s1 + $0x60] sm:$0xff]   ;;  %v499_v22 = vld [vmem:[%s638_s1 + $0x68] sm:$0xff]   ;;  %v106_v37 = vsub.s32 %v103_v32, %v89_v31 }
   0x6   :  { %456 = vmatprep.subr.bf16.mxu1 %v484_v7  ;;  %v492_v15 = vld [vmem:[%s638_s1 + $0xd8] sm:$0xff]   ;;  %v496_v19 = vld [vmem:[%s638_s1 + $0xe0] sm:$0xff]   ;;  %v500_v23 = vld [vmem:[%s638_s1 + $0xe8] sm:$0xff]  }
   0x7   :  { %v493_v16 = vld [vmem:[%s638_s1 + $0x18] sm:$0xff]   ;;  %v497_v20 = vld [vmem:[%s638_s1 + $0x20] sm:$0xff]   ;;  %v501_v27 = vld [vmem:[%s638_s1 + $0x28] sm:$0xff]  }
   0x8   :  { %435 = vmatpush3.bf16.msra.mxu0 %v485_v8  ;;  %v494_v17 = vld [vmem:[%s638_s1 + $0x98] sm:$0xff]   ;;  %v498_v21 = vld [vmem:[%s638_s1 + $0xa0] sm:$0xff]   ;;  %v502_v28 = vld [vmem:[%s638_s1 + $0xa8] sm:$0xff]  }
   0x9   :  { %457 = vmatpush3.bf16.msra.mxu1 %v486_v9  ;;  %436 = vmatprep.subr.bf16.mxu0 %v487_v10  ;;  %v503_v29 = vld [vmem:[%s638_s1 + $0x70] sm:$0xff]   ;;  %v507_v35 = vld [vmem:[%s638_s1 + $0x78] sm:$0xff]   ;;  %v399_v40 = vld.sshfl [vmem:[%s640_s0] sm:$0x33 pattern:$0x75316420] }
   0xa   :  { %458 = vmatprep.subr.bf16.mxu1 %v488_v11  ;;  %v504_v30 = vld [vmem:[%s638_s1 + $0xf0] sm:$0xff]   ;;  %v508_v36 = vld [vmem:[%s638_s1 + $0xf8] sm:$0xff]   ;;  %v82_v41 = vld [vmem:[#allocation2] sm:$0x1]  ;;  %v100_v42 = vcombine.high %v399_v40, %v399_v40  ;;  %v107_v43 = vrot.slane %v399_v40, %v106_v37 }
   0xb   :  { %v505_v33 = vld [vmem:[%s638_s1 + $0x30] sm:$0xff]   ;;  %v509_v38 = vld [vmem:[%s638_s1 + $0x38] sm:$0xff]   ;;  %85 = vperm.xlu0 %478, %v82_v41  }
   0xc   :  { %437 = vmatpush3.bf16.msra.mxu0 %v489_v12  ;;  %v506_v34 = vld [vmem:[%s638_s1 + $0xb0] sm:$0xff]   ;;  %v510_v39 = vld [vmem:[%s638_s1 + $0xb8] sm:$0xff]   ;;  %v114_v44 = vrot.slane %v100_v42, %v106_v37  ;;  %v115_v45 = vcombine.high %v107_v43, %v107_v43 }
   0xd   :  { %459 = vmatpush3.bf16.msra.mxu1 %v490_v13  ;;  %438 = vmatprep.subr.bf16.mxu0 %v491_v14 }
   0xe   :  { %460 = vmatprep.subr.bf16.mxu1 %v492_v15  ;;  %345 = vmatprep.mubr.bf16.mxu0 %v114_v44  ;;  %v116_v46 = vcombine.high %v114_v44, %v114_v44 }
  0x10   :  { %439 = vmatpush3.bf16.msra.mxu0 %v493_v16  ;;  %385 = vmatprep.mubr.bf16.mxu1 %v116_v46 }
  0x11   :  { %461 = vmatpush3.bf16.msra.mxu1 %v494_v17  ;;  %440 = vmatprep.subr.bf16.mxu0 %v495_v18 }
  0x12   :  { %462 = vmatprep.subr.bf16.mxu1 %v496_v19 }
  0x14   :  { %441 = vmatpush3.bf16.msra.mxu0 %v497_v20 }
  0x15   :  { %463 = vmatpush3.bf16.msra.mxu1 %v498_v21  ;;  %442 = vmatprep.subr.bf16.mxu0 %v499_v22 }
  0x16   :  { %464 = vmatprep.subr.bf16.mxu1 %v500_v23 }
  0x18   :  { %443 = vmatpush3.bf16.msra.mxu0 %v501_v27 }
  0x19   :  { %465 = vmatpush3.bf16.msra.mxu1 %v502_v28  ;;  %444 = vmatprep.subr.bf16.mxu0 %v503_v29 }
  0x1a   :  { %466 = vmatprep.subr.bf16.mxu1 %v504_v30 }
  0x1c   :  { %445 = vmatpush3.bf16.msra.mxu0 %v505_v33 }
  0x1d   :  { %467 = vmatpush3.bf16.msra.mxu1 %v506_v34  ;;  %446 = vmatprep.subr.bf16.mxu0 %v507_v35 }
  0x1e   :  { %468 = vmatprep.subr.bf16.mxu1 %v508_v36 }
  0x20   :  { %447 = vmatpush3.bf16.msra.mxu0 %v509_v38 }
  0x21   :  { %469 = vmatpush3.bf16.msra.mxu1 %v510_v39 }
  0x23   :  { %346 = vmatmul.mubr.bf16.vlgmr.msra.gmra.mrb[0].mxu0 %v107_v43 }
  0x24   :  { %386 = vmatmul.mubr.bf16.vlgmr.msra.gmra.mrb[0].mxu1 %v115_v45 }
  0x8a   :  { %v86_v48 = vpop.permute.xlu0 %85 }
  0x8b   :  { %v91_v50 = vrot.slane %v86_v48, %v90_v47 }
  0xf6   :  { %v448_v49 = vpop.f32.mrb[0].mxu0 }
  0xf7   :  { %v449_v51 = vpop.f32.mrb[1].mxu0  ;;  %v470_v52 = vpop.f32.mrb[0].mxu1 }
  0xf8   :  { %v450_v53 = vadd.f32 %v449_v51, %v448_v49  ;;  %v451_v54 = vpop.f32.mrb[2].mxu0  ;;  %v471_v55 = vpop.f32.mrb[1].mxu1 }
  0xf9   :  { %v452_v56 = vpop.f32.mrb[3].mxu0  ;;  %v472_v58 = vadd.f32 %v471_v55, %v470_v52  ;;  %v473_v59 = vpop.f32.mrb[2].mxu1 }
  0xfa   :  { %v348_v57 = vadd.f32 %v450_v53, %v91_v50  ;;  %v474_v60 = vpop.f32.mrb[3].mxu1 }
  0xfc   :  { %v388_v61 = vadd.f32 %v472_v58, %v348_v57 }
  0xfe   :  { %394 = vst.msk [vmem:[%s641_s3] sm:$0x1] %vm393_vm0, %v388_v61 }

</bundles_post_ra>
